<compile_context>
chip_gen: v6e
topology: v6e:2x2x1
jax: 0.10.0
libtpu: 0.0.40
codegen_flags: <defaults>
</compile_context>

<pallas_src>
import math
import functools

import jax
import jax.numpy as jnp
from jax import lax
from jax.experimental import pallas as pl
from jax.experimental.pallas import tpu as pltpu


def _attention_block_kernel(x_ref, gamma_ref, beta_ref, grp_ref,
                            wq_ref, bq_ref, wk_ref, bk_ref, wv_ref, bv_ref,
                            wp_ref, bp_ref,
                            o_ref,
                            k_scr, v_scr, scale_scr, shift_scr,
                            *, num_groups, eps, q_tile):
    # x_ref: (N, C) f32 (batch dim squeezed), full token range for this batch.
    N, C = x_ref.shape
    cpg = C // num_groups
    inv_count = 1.0 / float(N * cpg)
    kv_tiles = N // q_tile          # static

    split = pl.program_id(1)
    qi = pl.program_id(2)
    num_q = pl.num_programs(2)

    # ---- once per (batch, core-split): GroupNorm stats + K, V cache --------
    # CORRECTNESS: this carry relies on the innermost grid axis (qi) being
    # "arbitrary" (sequential, qi==0 visited first for every (b, split)) and on
    # scratch being per-core under megacore sharding of the parallel axes.
    # Do NOT mark the qi axis "parallel" or reorder the grid.
    @pl.when(qi == 0)
    def _():
        grp = grp_ref[...].astype(jnp.float32)          # 0/1 indicator (exact)

        # slab-wise channel sums (keeps sums in f32, no full (N,C) temp).
        def _sum_body(i, acc):
            r = pl.multiple_of(i * q_tile, q_tile)
            return acc + jnp.sum(x_ref[pl.ds(r, q_tile), :],
                                 axis=0, keepdims=True)
        ch_sum = lax.fori_loop(0, kv_tiles, _sum_body,
                               jnp.zeros((1, C), jnp.float32))
        mean = jnp.dot(ch_sum, grp,
                       preferred_element_type=jnp.float32) * inv_count

        # two-pass centered variance, accumulated slab-wise.
        def _var_body(i, acc):
            r = pl.multiple_of(i * q_tile, q_tile)
            xc = x_ref[pl.ds(r, q_tile), :] - mean
            return acc + jnp.sum(xc * xc, axis=0, keepdims=True)
        ch_sq = lax.fori_loop(0, kv_tiles, _var_body,
                              jnp.zeros((1, C), jnp.float32))
        var = jnp.dot(ch_sq, grp,
                      preferred_element_type=jnp.float32) * inv_count
        rstd = lax.rsqrt(var + eps)
        scale = rstd * gamma_ref[...]                   # (1, C)
        shift = beta_ref[...] - mean * scale            # (1, C)
        scale_scr[...] = scale
        shift_scr[...] = shift

        # K / V built slab-by-slab: each (q_tile, C) f32 matmul result is cast
        # to bf16 and stored before the next slab starts, so the peak VMEM
        # footprint is one slab, not two full (N, C) f32 matrices.
        @pl.loop(0, kv_tiles)
        def _(i):
            r = pl.multiple_of(i * q_tile, q_tile)
            hs = (x_ref[pl.ds(r, q_tile), :] * scale + shift).astype(jnp.bfloat16)
            ks = jnp.dot(hs, wk_ref[...],
                         preferred_element_type=jnp.float32) + bk_ref[...]
            k_scr[pl.ds(r, q_tile), :] = ks.astype(jnp.bfloat16)
            vs = jnp.dot(hs, wv_ref[...],
                         preferred_element_type=jnp.float32) + bv_ref[...]
            v_scr[pl.ds(r, q_tile), :] = vs.astype(jnp.bfloat16)

    # ---- per query tile -----------------------------------------------------
    row0 = pl.multiple_of((split * num_q + qi) * q_tile, q_tile)
    x_t = x_ref[pl.ds(row0, q_tile), :]                          # (tq, C) f32
    h_t = (x_t * scale_scr[...] + shift_scr[...]).astype(jnp.bfloat16)

    # 1/sqrt(C) is folded into wq/bq in the wrapper (no per-tile scale op).
    q = (jnp.dot(h_t, wq_ref[...], preferred_element_type=jnp.float32)
         + bq_ref[...]).astype(jnp.bfloat16)                     # (tq, C) bf16

    # scores: contract last dims ('qc,nc->qn'), no explicit K transpose.
    # (If bundles showed a per-tile relayout of K here, store K as (C, N).)
    s = lax.dot_general(q, k_scr[...], (((1,), (1,)), ((), ())),
                        preferred_element_type=jnp.float32)      # (tq, N)
    m = jnp.max(s, axis=-1, keepdims=True)
    p = jnp.exp(s - m)
    denom = jnp.sum(p, axis=-1, keepdims=True)                   # (tq, 1)
    out = jnp.dot(p.astype(jnp.bfloat16), v_scr[...],
                  preferred_element_type=jnp.float32)            # (tq, C)
    out = out * pl.reciprocal(denom, approx=True)

    # 1x1 proj conv + residual
    y = x_t + jnp.dot(out.astype(jnp.bfloat16), wp_ref[...],
                      preferred_element_type=jnp.float32) + bp_ref[...]
    o_ref[...] = y


def _chip_kind():
    try:
        kind = jax.devices()[0].device_kind.lower()
    except Exception:
        return "other"
    if "v7" in kind:
        return "v7x"
    if "v6" in kind:
        return "v6e"
    if "v5e" in kind or "v5 lite" in kind or "v5litepod" in kind:
        return "v5e"
    return "other"


def _pick_q_tile(n, chip):
    # Monolithic for small N; otherwise tile queries so the (tq, N) score
    # block fits comfortably in VMEM.  v6e (128 MiB VMEM) prefers big tiles
    # (fewer ~0.35us grid steps); v7x (64 MiB) prefers 256; v5e is MXU-bound so
    # small 128-multiples are already optimal.
    if n <= 1024:
        return n
    if chip == "v6e":
        cands = (1024, 512, 256, 128)
    elif chip == "v7x":
        cands = (256, 128) if n >= 2048 else (512, 256, 128)
    else:
        cands = (256, 128)
    for t in cands:
        if n % t == 0:
            return t
    return n


def attention_block(x_nchw, params, *, num_groups=32, eps=1e-5):
    """x_nchw: (B, C, H, W) float32. Returns (B, C, H, W)."""
    B, C, H, W = x_nchw.shape
    N = H * W
    chip = _chip_kind()
    tq = _pick_q_tile(N, chip)
    assert N % tq == 0
    nq = N // tq

    # When B == 1 on v7x, batch-only megacore parallelism idles one TensorCore:
    # split the query-tile range 2-ways (K/V recomputed per split, cheap).
    core_split = 2 if (chip == "v7x" and B == 1 and nq % 2 == 0) else 1
    nq_per = nq // core_split

    # NCHW -> token layout (B, N, C)
    # TODO(synk): if the surrounding model is NHWC end-to-end these transposes
    # can be dropped entirely.
    x_tok = jnp.transpose(x_nchw, (0, 2, 3, 1)).reshape(B, N, C)

    gamma = params["gn_weight"].reshape(1, C).astype(jnp.float32)
    beta = params["gn_bias"].reshape(1, C).astype(jnp.float32)

    # 1x1 conv weights: PyTorch (out, in, 1, 1); token matmul uses (in, out).
    # Softmax scale 1/sqrt(C) folded into Wq/bq at trace time.
    inv_sqrt_c = 1.0 / math.sqrt(C)
    wqkv = params["qkv_weight"].reshape(3 * C, C)
    wq = (wqkv[0 * C:1 * C].T * inv_sqrt_c).astype(jnp.bfloat16)   # (C, C)
    wk = wqkv[1 * C:2 * C].T.astype(jnp.bfloat16)
    wv = wqkv[2 * C:3 * C].T.astype(jnp.bfloat16)
    bqkv = params["qkv_bias"].reshape(3, 1, C).astype(jnp.float32)
    bq = bqkv[0] * inv_sqrt_c
    bk, bv = bqkv[1], bqkv[2]
    wp = params["proj_weight"].reshape(C, C).T.astype(jnp.bfloat16)
    bp = params["proj_bias"].reshape(1, C).astype(jnp.float32)

    # Precomputed (C, C) same-group indicator; 0/1 is exact in bf16 and it is
    # promoted back to f32 inside the (tiny) stats dots in the kernel.
    cpg = C // num_groups
    ch_grp = jnp.arange(C, dtype=jnp.int32) // cpg
    same_group = (ch_grp[:, None] == ch_grp[None, :]).astype(jnp.bfloat16)

    kernel = functools.partial(_attention_block_kernel,
                               num_groups=num_groups, eps=eps, q_tile=tq)

    flops = B * (2 * N * C * 3 * C        # qkv
                 + 4 * N * N * C          # q.k^T and attn.v
                 + 2 * N * C * C)         # proj
    transcendentals = B * N * N           # exp
    bytes_accessed = 4 * (2 * B * N * C) + 2 * (4 * C * C) + 2 * C * C

    # vmem_limit: leave headroom below physical VMEM (v7x has only 64 MiB).
    vmem_limit = {"v7x": 56, "v6e": 100, "v5e": 64}.get(chip, 64) * 1024 * 1024

    def run(buffer_hints):
        def spec(shape, index_map, single_buffer):
            if buffer_hints and single_buffer:
                return pl.BlockSpec(shape, index_map,
                                    pipeline_mode=pl.Buffered(1))
            return pl.BlockSpec(shape, index_map)

        def const_cc():
            return spec((C, C), lambda b, s, qi: (0, 0), True)

        def const_1c():
            return spec((1, C), lambda b, s, qi: (0, 0), True)

        # x only changes on the batch axis; single-buffer it on v7x where VMEM
        # is the binding constraint (exposed DMA once per batch element).
        x_spec = spec((None, N, C), lambda b, s, qi: (b, 0, 0), chip == "v7x")

        return pl.pallas_call(
            kernel,
            out_shape=jax.ShapeDtypeStruct((B, N, C), jnp.float32),
            grid_spec=pltpu.PrefetchScalarGridSpec(
                num_scalar_prefetch=0,
                grid=(B, core_split, nq_per),
                in_specs=[
                    x_spec,                                     # x tokens
                    const_1c(), const_1c(),                     # gamma, beta
                    const_cc(),                                 # group indicator
                    const_cc(), const_1c(),                     # Wq (pre-scaled), bq
                    const_cc(), const_1c(),                     # Wk, bk
                    const_cc(), const_1c(),                     # Wv, bv
                    const_cc(), const_1c(),                     # Wproj, bproj
                ],
                out_specs=pl.BlockSpec(
                    (None, tq, C), lambda b, s, qi: (b, s * nq_per + qi, 0)),
                scratch_shapes=[
                    pltpu.VMEM((N, C), jnp.bfloat16),    # K cache
                    pltpu.VMEM((N, C), jnp.bfloat16),    # V cache
                    pltpu.VMEM((1, C), jnp.float32),     # GN scale (rstd*gamma)
                    pltpu.VMEM((1, C), jnp.float32),     # GN shift (beta-mean*scale)
                ],
            ),
            compiler_params=pltpu.CompilerParams(
                dimension_semantics=("parallel", "parallel", "arbitrary"),
                vmem_limit_bytes=vmem_limit,
            ),
            cost_estimate=pl.CostEstimate(flops=flops,
                                          transcendentals=transcendentals,
                                          bytes_accessed=bytes_accessed),
        )(x_tok, gamma, beta, same_group, wq, bq, wk, bk, wv, bv, wp, bp)

    try:
        out_tok = run(True)
    except Exception:
        # pl.Buffered pipeline hints rejected on this jax/libtpu build: fall
        # back to default double buffering (identical numerics, more VMEM).
        out_tok = run(False)

    # token layout -> NCHW
    return jnp.transpose(out_tok.reshape(B, H, W, C), (0, 3, 1, 2))


def attention_block_ref(x, params, *, num_groups=32, eps=1e-5):
    """Pure-JAX f32 reference matching the PyTorch forward."""
    B, C, H, W = x.shape
    g = num_groups
    xg = x.reshape(B, g, C // g, H, W)
    mean = jnp.mean(xg, axis=(2, 3, 4), keepdims=True)
    var = jnp.mean((xg - mean) ** 2, axis=(2, 3, 4), keepdims=True)
    h = ((xg - mean) / jnp.sqrt(var + eps)).reshape(B, C, H, W)
    h = h * params["gn_weight"][None, :, None, None] + \
        params["gn_bias"][None, :, None, None]

    wqkv = params["qkv_weight"].reshape(3 * C, C)
    qkv = jnp.einsum("bchw,oc->bohw", h, wqkv) + \
        params["qkv_bias"][None, :, None, None]
    qkv = qkv.reshape(B, 3, C, H * W)
    q, k, v = qkv[:, 0], qkv[:, 1], qkv[:, 2]
    q = jnp.transpose(q, (0, 2, 1))
    k = jnp.transpose(k, (0, 2, 1))
    v = jnp.transpose(v, (0, 2, 1))
    attn = jax.nn.softmax(jnp.einsum("bnc,bmc->bnm", q, k) / math.sqrt(C), -1)
    out = jnp.einsum("bnm,bmc->bnc", attn, v)
    out = jnp.transpose(out, (0, 2, 1)).reshape(B, C, H, W)
    wproj = params["proj_weight"].reshape(C, C)
    proj = jnp.einsum("bchw,oc->bohw", out, wproj) + \
        params["proj_bias"][None, :, None, None]
    return x + proj


def init_params(key, channels):
    ks = jax.random.split(key, 6)
    return {
        "gn_weight": 1.0 + 0.1 * jax.random.normal(ks[0], (channels,), jnp.float32),
        "gn_bias": 0.1 * jax.random.normal(ks[1], (channels,), jnp.float32),
        "qkv_weight": 0.05 * jax.random.normal(ks[2], (3 * channels, channels, 1, 1), jnp.float32),
        "qkv_bias": 0.05 * jax.random.normal(ks[3], (3 * channels,), jnp.float32),
        "proj_weight": 0.05 * jax.random.normal(ks[4], (channels, channels, 1, 1), jnp.float32),
        "proj_bias": 0.05 * jax.random.normal(ks[5], (channels,), jnp.float32),
    }


if __name__ == "__main__":
    key = jax.random.PRNGKey(0)
    k_x, k_p = jax.random.split(key)

    B, C, H, W = 2, 32, 8, 8   # GroupNorm(32, C) requires C % 32 == 0
    x = jax.random.normal(k_x, (B, C, H, W), jnp.float32)
    params = init_params(k_p, C)

    out = jax.block_until_ready(attention_block(x, params))
    ref = attention_block_ref(x, params)

    assert out.shape == (B, C, H, W)
    max_err = float(jnp.max(jnp.abs(out - ref)))
    # bf16 MXU inputs (f32 accumulate) + approx reciprocal -> slightly looser
    # tolerance than the pure-f32 path.
    assert jnp.allclose(out, ref, atol=2e-2, rtol=2e-2), \
        f"max abs err = {max_err}"
    print("KERNEL_OK")
</pallas_src>

<mosaic_0001>
module attributes {stable_mosaic.version = 11 : i64} {
  func.func @_attention_block_kernel(%arg0: i32, %arg1: i32, %arg2: i32, %arg3: memref<1x64x32xf32, #tpu.memory_space<vmem>>, %arg4: memref<1x32xf32, #tpu.memory_space<vmem>>, %arg5: memref<1x32xf32, #tpu.memory_space<vmem>>, %arg6: memref<32x32xbf16, #tpu.memory_space<vmem>>, %arg7: memref<32x32xbf16, #tpu.memory_space<vmem>>, %arg8: memref<1x32xf32, #tpu.memory_space<vmem>>, %arg9: memref<32x32xbf16, #tpu.memory_space<vmem>>, %arg10: memref<1x32xf32, #tpu.memory_space<vmem>>, %arg11: memref<32x32xbf16, #tpu.memory_space<vmem>>, %arg12: memref<1x32xf32, #tpu.memory_space<vmem>>, %arg13: memref<32x32xbf16, #tpu.memory_space<vmem>>, %arg14: memref<1x32xf32, #tpu.memory_space<vmem>>, %arg15: memref<1x64x32xf32, #tpu.memory_space<vmem>>, %arg16: memref<64x32xbf16, #tpu.memory_space<vmem>>, %arg17: memref<64x32xbf16, #tpu.memory_space<vmem>>, %arg18: memref<1x32xf32, #tpu.memory_space<vmem>>, %arg19: memref<1x32xf32, #tpu.memory_space<vmem>>) attributes {dimension_semantics = [#tpu.dimension_semantics<parallel>, #tpu.dimension_semantics<parallel>, #tpu.dimension_semantics<arbitrary>], iteration_bounds = array<i64: 2, 1, 1>, scalar_prefetch = 0 : i64, scratch_operands = 4 : i64, tpu.core_type = #tpu.core_type<tc>, window_params = [{transform_indices = @transform_0, window_bounds = array<i64: 1, 64, 32>}, {pipeline_mode = #tpu.pipeline_mode<synchronous>, transform_indices = @transform_1, window_bounds = array<i64: 1, 32>}, {pipeline_mode = #tpu.pipeline_mode<synchronous>, transform_indices = @transform_2, window_bounds = array<i64: 1, 32>}, {pipeline_mode = #tpu.pipeline_mode<synchronous>, transform_indices = @transform_3, window_bounds = array<i64: 32, 32>}, {pipeline_mode = #tpu.pipeline_mode<synchronous>, transform_indices = @transform_4, window_bounds = array<i64: 32, 32>}, {pipeline_mode = #tpu.pipeline_mode<synchronous>, transform_indices = @transform_5, window_bounds = array<i64: 1, 32>}, {pipeline_mode = #tpu.pipeline_mode<synchronous>, transform_indices = @transform_6, window_bounds = array<i64: 32, 32>}, {pipeline_mode = #tpu.pipeline_mode<synchronous>, transform_indices = @transform_7, window_bounds = array<i64: 1, 32>}, {pipeline_mode = #tpu.pipeline_mode<synchronous>, transform_indices = @transform_8, window_bounds = array<i64: 32, 32>}, {pipeline_mode = #tpu.pipeline_mode<synchronous>, transform_indices = @transform_9, window_bounds = array<i64: 1, 32>}, {pipeline_mode = #tpu.pipeline_mode<synchronous>, transform_indices = @transform_10, window_bounds = array<i64: 32, 32>}, {pipeline_mode = #tpu.pipeline_mode<synchronous>, transform_indices = @transform_11, window_bounds = array<i64: 1, 32>}, {transform_indices = @transform_12, window_bounds = array<i64: 1, 64, 32>}]} {
    %c0_i32 = arith.constant 0 : i32
    %0 = arith.cmpi eq, %arg2, %c0_i32 : i32
    %1 = arith.extui %0 : i1 to i32
    %c0_i32_0 = arith.constant 0 : i32
    %2 = arith.cmpi ne, %1, %c0_i32_0 : i32
    scf.if %2 {
      %c0_26 = arith.constant 0 : index
      %c0_27 = arith.constant 0 : index
      %48 = vector.load %arg6[%c0_26, %c0_27] : memref<32x32xbf16, #tpu.memory_space<vmem>>, vector<32x32xbf16>
      %49 = arith.extf %48 : vector<32x32xbf16> to vector<32x32xf32>
      %cst_28 = arith.constant 0.000000e+00 : f32
      %50 = vector.broadcast %cst_28 : f32 to vector<1x32xf32>
      %c0_i32_29 = arith.constant 0 : i32
      %c64_i32_30 = arith.constant 64 : i32
      %51 = arith.muli %c0_i32_29, %c64_i32_30 : i32
      %52 = tpu.assume_multiple %51, 64 : i32
      %c0_31 = arith.constant 0 : index
      %53 = arith.index_cast %52 : i32 to index
      %c0_32 = arith.constant 0 : index
      %54 = vector.load %arg3[%c0_31, %53, %c0_32] : memref<1x64x32xf32, #tpu.memory_space<vmem>>, vector<1x64x32xf32>
      %55 = vector.shape_cast %54 : vector<1x64x32xf32> to vector<64x32xf32>
      %cst_33 = arith.constant dense<0.000000e+00> : vector<32xf32>
      %56 = vector.multi_reduction <add>, %55, %cst_33 [0] : vector<64x32xf32> to vector<32xf32>
      %57 = vector.shape_cast %56 : vector<32xf32> to vector<1x32xf32>
      %58 = arith.addf %50, %57 : vector<1x32xf32>
      %c1_i32_34 = arith.constant 1 : i32
      %cst_35 = arith.constant dense<0.000000e+00> : vector<1x32xf32>
      %59 = tpu.matmul %58, %49, %cst_35 {dimension_numbers = #tpu.dot_dimension_numbers<[1], [0], [0], [1], [0, 0, 1, 1], [], []>} : vector<1x32xf32>, vector<32x32xf32>, vector<1x32xf32> -> vector<1x32xf32>
      %cst_36 = arith.constant 1.562500e-02 : f32
      %60 = vector.broadcast %cst_36 : f32 to vector<1x32xf32>
      %61 = arith.mulf %59, %60 : vector<1x32xf32>
      %cst_37 = arith.constant 0.000000e+00 : f32
      %62 = vector.broadcast %cst_37 : f32 to vector<1x32xf32>
      %c0_i32_38 = arith.constant 0 : i32
      %c64_i32_39 = arith.constant 64 : i32
      %63 = arith.muli %c0_i32_38, %c64_i32_39 : i32
      %64 = tpu.assume_multiple %63, 64 : i32
      %c0_40 = arith.constant 0 : index
      %65 = arith.index_cast %64 : i32 to index
      %c0_41 = arith.constant 0 : index
      %66 = vector.load %arg3[%c0_40, %65, %c0_41] : memref<1x64x32xf32, #tpu.memory_space<vmem>>, vector<1x64x32xf32>
      %67 = vector.shape_cast %66 : vector<1x64x32xf32> to vector<64x32xf32>
      %68 = vector.broadcast %61 : vector<1x32xf32> to vector<64x32xf32>
      %69 = arith.subf %67, %68 : vector<64x32xf32>
      %70 = arith.mulf %69, %69 : vector<64x32xf32>
      %cst_42 = arith.constant dense<0.000000e+00> : vector<32xf32>
      %71 = vector.multi_reduction <add>, %70, %cst_42 [0] : vector<64x32xf32> to vector<32xf32>
      %72 = vector.shape_cast %71 : vector<32xf32> to vector<1x32xf32>
      %73 = arith.addf %62, %72 : vector<1x32xf32>
      %c1_i32_43 = arith.constant 1 : i32
      %cst_44 = arith.constant dense<0.000000e+00> : vector<1x32xf32>
      %74 = tpu.matmul %73, %49, %cst_44 {dimension_numbers = #tpu.dot_dimension_numbers<[1], [0], [0], [1], [0, 0, 1, 1], [], []>} : vector<1x32xf32>, vector<32x32xf32>, vector<1x32xf32> -> vector<1x32xf32>
      %cst_45 = arith.constant 1.562500e-02 : f32
      %75 = vector.broadcast %cst_45 : f32 to vector<1x32xf32>
      %76 = arith.mulf %74, %75 : vector<1x32xf32>
      %cst_46 = arith.constant 9.99999974E-6 : f32
      %77 = vector.broadcast %cst_46 : f32 to vector<1x32xf32>
      %78 = arith.addf %76, %77 : vector<1x32xf32>
      %79 = math.rsqrt %78 : vector<1x32xf32>
      %c0_47 = arith.constant 0 : index
      %c0_48 = arith.constant 0 : index
      %80 = vector.load %arg4[%c0_47, %c0_48] : memref<1x32xf32, #tpu.memory_space<vmem>>, vector<1x32xf32>
      %81 = arith.mulf %79, %80 : vector<1x32xf32>
      %c0_49 = arith.constant 0 : index
      %c0_50 = arith.constant 0 : index
      %82 = vector.load %arg5[%c0_49, %c0_50] : memref<1x32xf32, #tpu.memory_space<vmem>>, vector<1x32xf32>
      %83 = arith.mulf %61, %81 : vector<1x32xf32>
      %84 = arith.subf %82, %83 : vector<1x32xf32>
      %c0_51 = arith.constant 0 : index
      %c0_52 = arith.constant 0 : index
      %85 = vector.load %arg18[%c0_51, %c0_52] : memref<1x32xf32, #tpu.memory_space<vmem>>, vector<1x32xf32>
      tpu.vector_store %arg18[%c0_51, %c0_52], %81 {strides = array<i32>} : memref<1x32xf32, #tpu.memory_space<vmem>>, vector<1x32xf32>,
      %c0_53 = arith.constant 0 : index
      %c0_54 = arith.constant 0 : index
      %86 = vector.load %arg19[%c0_53, %c0_54] : memref<1x32xf32, #tpu.memory_space<vmem>>, vector<1x32xf32>
      tpu.vector_store %arg19[%c0_53, %c0_54], %84 {strides = array<i32>} : memref<1x32xf32, #tpu.memory_space<vmem>>, vector<1x32xf32>,
      %c0_i32_55 = arith.constant 0 : i32
      %c1_i32_56 = arith.constant 1 : i32
      %87 = arith.muli %c0_i32_55, %c1_i32_56 : i32
      %c0_i32_57 = arith.constant 0 : i32
      %88 = arith.addi %c0_i32_57, %87 : i32
      %c64_i32_58 = arith.constant 64 : i32
      %89 = arith.muli %88, %c64_i32_58 : i32
      %90 = tpu.assume_multiple %89, 64 : i32
      %c0_59 = arith.constant 0 : index
      %91 = arith.index_cast %90 : i32 to index
      %c0_60 = arith.constant 0 : index
      %92 = vector.load %arg3[%c0_59, %91, %c0_60] : memref<1x64x32xf32, #tpu.memory_space<vmem>>, vector<1x64x32xf32>
      %93 = vector.shape_cast %92 : vector<1x64x32xf32> to vector<64x32xf32>
      %94 = vector.broadcast %81 : vector<1x32xf32> to vector<64x32xf32>
      %95 = arith.mulf %93, %94 : vector<64x32xf32>
      %96 = vector.broadcast %84 : vector<1x32xf32> to vector<64x32xf32>
      %97 = arith.addf %95, %96 : vector<64x32xf32>
      %98 = arith.truncf %97 : vector<64x32xf32> to vector<64x32xbf16>
      %c0_61 = arith.constant 0 : index
      %c0_62 = arith.constant 0 : index
      %99 = vector.load %arg9[%c0_61, %c0_62] : memref<32x32xbf16, #tpu.memory_space<vmem>>, vector<32x32xbf16>
      %cst_63 = arith.constant dense<0.000000e+00> : vector<64x32xf32>
      %100 = tpu.matmul %98, %99, %cst_63 {dimension_numbers = #tpu.dot_dimension_numbers<[1], [0], [0], [1], [0, 0, 1, 1], [], []>} : vector<64x32xbf16>, vector<32x32xbf16>, vector<64x32xf32> -> vector<64x32xf32>
      %c0_64 = arith.constant 0 : index
      %c0_65 = arith.constant 0 : index
      %101 = vector.load %arg10[%c0_64, %c0_65] : memref<1x32xf32, #tpu.memory_space<vmem>>, vector<1x32xf32>
      %102 = vector.broadcast %101 : vector<1x32xf32> to vector<64x32xf32>
      %103 = arith.addf %100, %102 : vector<64x32xf32>
      %104 = arith.truncf %103 : vector<64x32xf32> to vector<64x32xbf16>
      %105 = arith.index_cast %90 : i32 to index
      %c0_66 = arith.constant 0 : index
      %106 = vector.load %arg16[%105, %c0_66] : memref<64x32xbf16, #tpu.memory_space<vmem>>, vector<64x32xbf16>
      tpu.vector_store %arg16[%105, %c0_66], %104 {strides = array<i32>} : memref<64x32xbf16, #tpu.memory_space<vmem>>, vector<64x32xbf16>,
      %c0_67 = arith.constant 0 : index
      %c0_68 = arith.constant 0 : index
      %107 = vector.load %arg11[%c0_67, %c0_68] : memref<32x32xbf16, #tpu.memory_space<vmem>>, vector<32x32xbf16>
      %cst_69 = arith.constant dense<0.000000e+00> : vector<64x32xf32>
      %108 = tpu.matmul %98, %107, %cst_69 {dimension_numbers = #tpu.dot_dimension_numbers<[1], [0], [0], [1], [0, 0, 1, 1], [], []>} : vector<64x32xbf16>, vector<32x32xbf16>, vector<64x32xf32> -> vector<64x32xf32>
      %c0_70 = arith.constant 0 : index
      %c0_71 = arith.constant 0 : index
      %109 = vector.load %arg12[%c0_70, %c0_71] : memref<1x32xf32, #tpu.memory_space<vmem>>, vector<1x32xf32>
      %110 = vector.broadcast %109 : vector<1x32xf32> to vector<64x32xf32>
      %111 = arith.addf %108, %110 : vector<64x32xf32>
      %112 = arith.truncf %111 : vector<64x32xf32> to vector<64x32xbf16>
      %113 = arith.index_cast %90 : i32 to index
      %c0_72 = arith.constant 0 : index
      %114 = vector.load %arg17[%113, %c0_72] : memref<64x32xbf16, #tpu.memory_space<vmem>>, vector<64x32xbf16>
      tpu.vector_store %arg17[%113, %c0_72], %112 {strides = array<i32>} : memref<64x32xbf16, #tpu.memory_space<vmem>>, vector<64x32xbf16>,
      %c1_i32_73 = arith.constant 1 : i32
    } else {
    }
    %c1_i32 = arith.constant 1 : i32
    %3 = arith.muli %arg1, %c1_i32 : i32
    %4 = arith.addi %3, %arg2 : i32
    %c64_i32 = arith.constant 64 : i32
    %5 = arith.muli %4, %c64_i32 : i32
    %6 = tpu.assume_multiple %5, 64 : i32
    %c0 = arith.constant 0 : index
    %7 = arith.index_cast %6 : i32 to index
    %c0_1 = arith.constant 0 : index
    %8 = vector.load %arg3[%c0, %7, %c0_1] : memref<1x64x32xf32, #tpu.memory_space<vmem>>, vector<1x64x32xf32>
    %9 = vector.shape_cast %8 : vector<1x64x32xf32> to vector<64x32xf32>
    %c0_2 = arith.constant 0 : index
    %c0_3 = arith.constant 0 : index
    %10 = vector.load %arg18[%c0_2, %c0_3] : memref<1x32xf32, #tpu.memory_space<vmem>>, vector<1x32xf32>
    %11 = vector.broadcast %10 : vector<1x32xf32> to vector<64x32xf32>
    %12 = arith.mulf %9, %11 : vector<64x32xf32>
    %c0_4 = arith.constant 0 : index
    %c0_5 = arith.constant 0 : index
    %13 = vector.load %arg19[%c0_4, %c0_5] : memref<1x32xf32, #tpu.memory_space<vmem>>, vector<1x32xf32>
    %14 = vector.broadcast %13 : vector<1x32xf32> to vector<64x32xf32>
    %15 = arith.addf %12, %14 : vector<64x32xf32>
    %16 = arith.truncf %15 : vector<64x32xf32> to vector<64x32xbf16>
    %c0_6 = arith.constant 0 : index
    %c0_7 = arith.constant 0 : index
    %17 = vector.load %arg7[%c0_6, %c0_7] : memref<32x32xbf16, #tpu.memory_space<vmem>>, vector<32x32xbf16>
    %cst = arith.constant dense<0.000000e+00> : vector<64x32xf32>
    %18 = tpu.matmul %16, %17, %cst {dimension_numbers = #tpu.dot_dimension_numbers<[1], [0], [0], [1], [0, 0, 1, 1], [], []>} : vector<64x32xbf16>, vector<32x32xbf16>, vector<64x32xf32> -> vector<64x32xf32>
    %c0_8 = arith.constant 0 : index
    %c0_9 = arith.constant 0 : index
    %19 = vector.load %arg8[%c0_8, %c0_9] : memref<1x32xf32, #tpu.memory_space<vmem>>, vector<1x32xf32>
    %20 = vector.broadcast %19 : vector<1x32xf32> to vector<64x32xf32>
    %21 = arith.addf %18, %20 : vector<64x32xf32>
    %22 = arith.truncf %21 : vector<64x32xf32> to vector<64x32xbf16>
    %c0_10 = arith.constant 0 : index
    %c0_11 = arith.constant 0 : index
    %23 = vector.load %arg16[%c0_10, %c0_11] : memref<64x32xbf16, #tpu.memory_space<vmem>>, vector<64x32xbf16>
    %cst_12 = arith.constant dense<0.000000e+00> : vector<64x64xf32>
    %24 = tpu.matmul %22, %23, %cst_12 {dimension_numbers = #tpu.dot_dimension_numbers<[1], [1], [0], [0], [0, 0, 1, 0], [], []>} : vector<64x32xbf16>, vector<64x32xbf16>, vector<64x64xf32> -> vector<64x64xf32>
    %cst_13 = arith.constant dense<0xFF800000> : vector<64xf32>
    %25 = vector.multi_reduction <maximumf>, %24, %cst_13 [1] : vector<64x64xf32> to vector<64xf32>
    %26 = vector.shape_cast %25 : vector<64xf32> to vector<64x1xf32>
    %27 = vector.broadcast %26 : vector<64x1xf32> to vector<64x64xf32>
    %28 = arith.subf %24, %27 : vector<64x64xf32>
    %29 = math.exp %28 : vector<64x64xf32>
    %cst_14 = arith.constant dense<0.000000e+00> : vector<64xf32>
    %30 = vector.multi_reduction <add>, %29, %cst_14 [1] : vector<64x64xf32> to vector<64xf32>
    %31 = vector.shape_cast %30 : vector<64xf32> to vector<64x1xf32>
    %32 = arith.truncf %29 : vector<64x64xf32> to vector<64x64xbf16>
    %c0_15 = arith.constant 0 : index
    %c0_16 = arith.constant 0 : index
    %33 = vector.load %arg17[%c0_15, %c0_16] : memref<64x32xbf16, #tpu.memory_space<vmem>>, vector<64x32xbf16>
    %cst_17 = arith.constant dense<0.000000e+00> : vector<64x32xf32>
    %34 = tpu.matmul %32, %33, %cst_17 {dimension_numbers = #tpu.dot_dimension_numbers<[1], [0], [0], [1], [0, 0, 1, 1], [], []>} : vector<64x64xbf16>, vector<64x32xbf16>, vector<64x32xf32> -> vector<64x32xf32>
    %35 = tpu.reciprocal %31 {approx = true} : vector<64x1xf32> -> vector<64x1xf32>
    %36 = vector.broadcast %35 : vector<64x1xf32> to vector<64x32xf32>
    %37 = arith.mulf %34, %36 : vector<64x32xf32>
    %38 = arith.truncf %37 : vector<64x32xf32> to vector<64x32xbf16>
    %c0_18 = arith.constant 0 : index
    %c0_19 = arith.constant 0 : index
    %39 = vector.load %arg13[%c0_18, %c0_19] : memref<32x32xbf16, #tpu.memory_space<vmem>>, vector<32x32xbf16>
    %cst_20 = arith.constant dense<0.000000e+00> : vector<64x32xf32>
    %40 = tpu.matmul %38, %39, %cst_20 {dimension_numbers = #tpu.dot_dimension_numbers<[1], [0], [0], [1], [0, 0, 1, 1], [], []>} : vector<64x32xbf16>, vector<32x32xbf16>, vector<64x32xf32> -> vector<64x32xf32>
    %41 = arith.addf %9, %40 : vector<64x32xf32>
    %c0_21 = arith.constant 0 : index
    %c0_22 = arith.constant 0 : index
    %42 = vector.load %arg14[%c0_21, %c0_22] : memref<1x32xf32, #tpu.memory_space<vmem>>, vector<1x32xf32>
    %43 = vector.broadcast %42 : vector<1x32xf32> to vector<64x32xf32>
    %44 = arith.addf %41, %43 : vector<64x32xf32>
    %c0_23 = arith.constant 0 : index
    %c0_24 = arith.constant 0 : index
    %c0_25 = arith.constant 0 : index
    %45 = vector.load %arg15[%c0_23, %c0_24, %c0_25] : memref<1x64x32xf32, #tpu.memory_space<vmem>>, vector<1x64x32xf32>
    %46 = vector.shape_cast %45 : vector<1x64x32xf32> to vector<64x32xf32>
    %47 = vector.shape_cast %44 : vector<64x32xf32> to vector<1x64x32xf32>
    tpu.vector_store %arg15[%c0_23, %c0_24, %c0_25], %47 {strides = array<i32>} : memref<1x64x32xf32, #tpu.memory_space<vmem>>, vector<1x64x32xf32>,
    return
  }
  func.func @transform_0(%arg0: i32, %arg1: i32, %arg2: i32) -> (i32, i32, i32) {
    %c0_i32 = arith.constant 0 : i32
    %c0_i32_0 = arith.constant 0 : i32
    %c0_i32_1 = arith.constant 0 : i32
    return %arg0, %c0_i32, %c0_i32_0 : i32, i32, i32
  }
  func.func @transform_1(%arg0: i32, %arg1: i32, %arg2: i32) -> (i32, i32) {
    %c0_i32 = arith.constant 0 : i32
    %c0_i32_0 = arith.constant 0 : i32
    %c0_i32_1 = arith.constant 0 : i32
    return %c0_i32, %c0_i32_0 : i32, i32
  }
  func.func @transform_2(%arg0: i32, %arg1: i32, %arg2: i32) -> (i32, i32) {
    %c0_i32 = arith.constant 0 : i32
    %c0_i32_0 = arith.constant 0 : i32
    %c0_i32_1 = arith.constant 0 : i32
    return %c0_i32, %c0_i32_0 : i32, i32
  }
  func.func @transform_3(%arg0: i32, %arg1: i32, %arg2: i32) -> (i32, i32) {
    %c0_i32 = arith.constant 0 : i32
    %c0_i32_0 = arith.constant 0 : i32
    %c0_i32_1 = arith.constant 0 : i32
    return %c0_i32, %c0_i32_0 : i32, i32
  }
  func.func @transform_4(%arg0: i32, %arg1: i32, %arg2: i32) -> (i32, i32) {
    %c0_i32 = arith.constant 0 : i32
    %c0_i32_0 = arith.constant 0 : i32
    %c0_i32_1 = arith.constant 0 : i32
    return %c0_i32, %c0_i32_0 : i32, i32
  }
  func.func @transform_5(%arg0: i32, %arg1: i32, %arg2: i32) -> (i32, i32) {
    %c0_i32 = arith.constant 0 : i32
    %c0_i32_0 = arith.constant 0 : i32
    %c0_i32_1 = arith.constant 0 : i32
    return %c0_i32, %c0_i32_0 : i32, i32
  }
  func.func @transform_6(%arg0: i32, %arg1: i32, %arg2: i32) -> (i32, i32) {
    %c0_i32 = arith.constant 0 : i32
    %c0_i32_0 = arith.constant 0 : i32
    %c0_i32_1 = arith.constant 0 : i32
    return %c0_i32, %c0_i32_0 : i32, i32
  }
  func.func @transform_7(%arg0: i32, %arg1: i32, %arg2: i32) -> (i32, i32) {
    %c0_i32 = arith.constant 0 : i32
    %c0_i32_0 = arith.constant 0 : i32
    %c0_i32_1 = arith.constant 0 : i32
    return %c0_i32, %c0_i32_0 : i32, i32
  }
  func.func @transform_8(%arg0: i32, %arg1: i32, %arg2: i32) -> (i32, i32) {
    %c0_i32 = arith.constant 0 : i32
    %c0_i32_0 = arith.constant 0 : i32
    %c0_i32_1 = arith.constant 0 : i32
    return %c0_i32, %c0_i32_0 : i32, i32
  }
  func.func @transform_9(%arg0: i32, %arg1: i32, %arg2: i32) -> (i32, i32) {
    %c0_i32 = arith.constant 0 : i32
    %c0_i32_0 = arith.constant 0 : i32
    %c0_i32_1 = arith.constant 0 : i32
    return %c0_i32, %c0_i32_0 : i32, i32
  }
  func.func @transform_10(%arg0: i32, %arg1: i32, %arg2: i32) -> (i32, i32) {
    %c0_i32 = arith.constant 0 : i32
    %c0_i32_0 = arith.constant 0 : i32
    %c0_i32_1 = arith.constant 0 : i32
    return %c0_i32, %c0_i32_0 : i32, i32
  }
  func.func @transform_11(%arg0: i32, %arg1: i32, %arg2: i32) -> (i32, i32) {
    %c0_i32 = arith.constant 0 : i32
    %c0_i32_0 = arith.constant 0 : i32
    %c0_i32_1 = arith.constant 0 : i32
    return %c0_i32, %c0_i32_0 : i32, i32
  }
  func.func @transform_12(%arg0: i32, %arg1: i32, %arg2: i32) -> (i32, i32, i32) {
    %c1_i32 = arith.constant 1 : i32
    %0 = arith.muli %arg1, %c1_i32 : i32
    %1 = arith.addi %0, %arg2 : i32
    %c0_i32 = arith.constant 0 : i32
    %c0_i32_0 = arith.constant 0 : i32
    return %arg0, %1, %c0_i32 : i32, i32, i32
  }
}

module attributes {stable_mosaic.version = 11 : i64} {
  func.func @_attention_block_kernel(%arg0: i32, %arg1: i32, %arg2: i32, %arg3: memref<1x64x32xf32, #tpu.memory_space<vmem>>, %arg4: memref<1x32xf32, #tpu.memory_space<vmem>>, %arg5: memref<1x32xf32, #tpu.memory_space<vmem>>, %arg6: memref<32x32xbf16, #tpu.memory_space<vmem>>, %arg7: memref<32x32xbf16, #tpu.memory_space<vmem>>, %arg8: memref<1x32xf32, #tpu.memory_space<vmem>>, %arg9: memref<32x32xbf16, #tpu.memory_space<vmem>>, %arg10: memref<1x32xf32, #tpu.memory_space<vmem>>, %arg11: memref<32x32xbf16, #tpu.memory_space<vmem>>, %arg12: memref<1x32xf32, #tpu.memory_space<vmem>>, %arg13: memref<32x32xbf16, #tpu.memory_space<vmem>>, %arg14: memref<1x32xf32, #tpu.memory_space<vmem>>, %arg15: memref<1x64x32xf32, #tpu.memory_space<vmem>>, %arg16: memref<64x32xbf16, #tpu.memory_space<vmem>>, %arg17: memref<64x32xbf16, #tpu.memory_space<vmem>>, %arg18: memref<1x32xf32, #tpu.memory_space<vmem>>, %arg19: memref<1x32xf32, #tpu.memory_space<vmem>>) attributes {dimension_semantics = [#tpu.dimension_semantics<parallel>, #tpu.dimension_semantics<parallel>, #tpu.dimension_semantics<arbitrary>], iteration_bounds = array<i64: 2, 1, 1>, scalar_prefetch = 0 : i64, scratch_operands = 4 : i64, tpu.core_type = #tpu.core_type<tc>, window_params = [{transform_indices = @transform_0, window_bounds = array<i64: 1, 64, 32>}, {pipeline_mode = #tpu.pipeline_mode<synchronous>, transform_indices = @transform_1, window_bounds = array<i64: 1, 32>}, {pipeline_mode = #tpu.pipeline_mode<synchronous>, transform_indices = @transform_2, window_bounds = array<i64: 1, 32>}, {pipeline_mode = #tpu.pipeline_mode<synchronous>, transform_indices = @transform_3, window_bounds = array<i64: 32, 32>}, {pipeline_mode = #tpu.pipeline_mode<synchronous>, transform_indices = @transform_4, window_bounds = array<i64: 32, 32>}, {pipeline_mode = #tpu.pipeline_mode<synchronous>, transform_indices = @transform_5, window_bounds = array<i64: 1, 32>}, {pipeline_mode = #tpu.pipeline_mode<synchronous>, transform_indices = @transform_6, window_bounds = array<i64: 32, 32>}, {pipeline_mode = #tpu.pipeline_mode<synchronous>, transform_indices = @transform_7, window_bounds = array<i64: 1, 32>}, {pipeline_mode = #tpu.pipeline_mode<synchronous>, transform_indices = @transform_8, window_bounds = array<i64: 32, 32>}, {pipeline_mode = #tpu.pipeline_mode<synchronous>, transform_indices = @transform_9, window_bounds = array<i64: 1, 32>}, {pipeline_mode = #tpu.pipeline_mode<synchronous>, transform_indices = @transform_10, window_bounds = array<i64: 32, 32>}, {pipeline_mode = #tpu.pipeline_mode<synchronous>, transform_indices = @transform_11, window_bounds = array<i64: 1, 32>}, {transform_indices = @transform_12, window_bounds = array<i64: 1, 64, 32>}]} {
    %c0_i32 = arith.constant 0 : i32
    %0 = arith.cmpi eq, %arg2, %c0_i32 : i32
    %1 = arith.extui %0 : i1 to i32
    %c0_i32_0 = arith.constant 0 : i32
    %2 = arith.cmpi ne, %1, %c0_i32_0 : i32
    scf.if %2 {
      %c0_26 = arith.constant 0 : index
      %c0_27 = arith.constant 0 : index
      %48 = vector.load %arg6[%c0_26, %c0_27] : memref<32x32xbf16, #tpu.memory_space<vmem>>, vector<32x32xbf16>
      %49 = arith.extf %48 : vector<32x32xbf16> to vector<32x32xf32>
      %cst_28 = arith.constant 0.000000e+00 : f32
      %50 = vector.broadcast %cst_28 : f32 to vector<1x32xf32>
      %c0_i32_29 = arith.constant 0 : i32
      %c64_i32_30 = arith.constant 64 : i32
      %51 = arith.muli %c0_i32_29, %c64_i32_30 : i32
      %52 = tpu.assume_multiple %51, 64 : i32
      %c0_31 = arith.constant 0 : index
      %53 = arith.index_cast %52 : i32 to index
      %c0_32 = arith.constant 0 : index
      %54 = vector.load %arg3[%c0_31, %53, %c0_32] : memref<1x64x32xf32, #tpu.memory_space<vmem>>, vector<1x64x32xf32>
      %55 = vector.shape_cast %54 : vector<1x64x32xf32> to vector<64x32xf32>
      %cst_33 = arith.constant dense<0.000000e+00> : vector<32xf32>
      %56 = vector.multi_reduction <add>, %55, %cst_33 [0] : vector<64x32xf32> to vector<32xf32>
      %57 = vector.shape_cast %56 : vector<32xf32> to vector<1x32xf32>
      %58 = arith.addf %50, %57 : vector<1x32xf32>
      %c1_i32_34 = arith.constant 1 : i32
      %cst_35 = arith.constant dense<0.000000e+00> : vector<1x32xf32>
      %59 = tpu.matmul %58, %49, %cst_35 {dimension_numbers = #tpu.dot_dimension_numbers<[1], [0], [0], [1], [0, 0, 1, 1], [], []>} : vector<1x32xf32>, vector<32x32xf32>, vector<1x32xf32> -> vector<1x32xf32>
      %cst_36 = arith.constant 1.562500e-02 : f32
      %60 = vector.broadcast %cst_36 : f32 to vector<1x32xf32>
      %61 = arith.mulf %59, %60 : vector<1x32xf32>
      %cst_37 = arith.constant 0.000000e+00 : f32
      %62 = vector.broadcast %cst_37 : f32 to vector<1x32xf32>
      %c0_i32_38 = arith.constant 0 : i32
      %c64_i32_39 = arith.constant 64 : i32
      %63 = arith.muli %c0_i32_38, %c64_i32_39 : i32
      %64 = tpu.assume_multiple %63, 64 : i32
      %c0_40 = arith.constant 0 : index
      %65 = arith.index_cast %64 : i32 to index
      %c0_41 = arith.constant 0 : index
      %66 = vector.load %arg3[%c0_40, %65, %c0_41] : memref<1x64x32xf32, #tpu.memory_space<vmem>>, vector<1x64x32xf32>
      %67 = vector.shape_cast %66 : vector<1x64x32xf32> to vector<64x32xf32>
      %68 = vector.broadcast %61 : vector<1x32xf32> to vector<64x32xf32>
      %69 = arith.subf %67, %68 : vector<64x32xf32>
      %70 = arith.mulf %69, %69 : vector<64x32xf32>
      %cst_42 = arith.constant dense<0.000000e+00> : vector<32xf32>
      %71 = vector.multi_reduction <add>, %70, %cst_42 [0] : vector<64x32xf32> to vector<32xf32>
      %72 = vector.shape_cast %71 : vector<32xf32> to vector<1x32xf32>
      %73 = arith.addf %62, %72 : vector<1x32xf32>
      %c1_i32_43 = arith.constant 1 : i32
      %cst_44 = arith.constant dense<0.000000e+00> : vector<1x32xf32>
      %74 = tpu.matmul %73, %49, %cst_44 {dimension_numbers = #tpu.dot_dimension_numbers<[1], [0], [0], [1], [0, 0, 1, 1], [], []>} : vector<1x32xf32>, vector<32x32xf32>, vector<1x32xf32> -> vector<1x32xf32>
      %cst_45 = arith.constant 1.562500e-02 : f32
      %75 = vector.broadcast %cst_45 : f32 to vector<1x32xf32>
      %76 = arith.mulf %74, %75 : vector<1x32xf32>
      %cst_46 = arith.constant 9.99999974E-6 : f32
      %77 = vector.broadcast %cst_46 : f32 to vector<1x32xf32>
      %78 = arith.addf %76, %77 : vector<1x32xf32>
      %79 = math.rsqrt %78 : vector<1x32xf32>
      %c0_47 = arith.constant 0 : index
      %c0_48 = arith.constant 0 : index
      %80 = vector.load %arg4[%c0_47, %c0_48] : memref<1x32xf32, #tpu.memory_space<vmem>>, vector<1x32xf32>
      %81 = arith.mulf %79, %80 : vector<1x32xf32>
      %c0_49 = arith.constant 0 : index
      %c0_50 = arith.constant 0 : index
      %82 = vector.load %arg5[%c0_49, %c0_50] : memref<1x32xf32, #tpu.memory_space<vmem>>, vector<1x32xf32>
      %83 = arith.mulf %61, %81 : vector<1x32xf32>
      %84 = arith.subf %82, %83 : vector<1x32xf32>
      %c0_51 = arith.constant 0 : index
      %c0_52 = arith.constant 0 : index
      %85 = vector.load %arg18[%c0_51, %c0_52] : memref<1x32xf32, #tpu.memory_space<vmem>>, vector<1x32xf32>
      tpu.vector_store %arg18[%c0_51, %c0_52], %81 {strides = array<i32>} : memref<1x32xf32, #tpu.memory_space<vmem>>, vector<1x32xf32>,
      %c0_53 = arith.constant 0 : index
      %c0_54 = arith.constant 0 : index
      %86 = vector.load %arg19[%c0_53, %c0_54] : memref<1x32xf32, #tpu.memory_space<vmem>>, vector<1x32xf32>
      tpu.vector_store %arg19[%c0_53, %c0_54], %84 {strides = array<i32>} : memref<1x32xf32, #tpu.memory_space<vmem>>, vector<1x32xf32>,
      %c0_i32_55 = arith.constant 0 : i32
      %c1_i32_56 = arith.constant 1 : i32
      %87 = arith.muli %c0_i32_55, %c1_i32_56 : i32
      %c0_i32_57 = arith.constant 0 : i32
      %88 = arith.addi %c0_i32_57, %87 : i32
      %c64_i32_58 = arith.constant 64 : i32
      %89 = arith.muli %88, %c64_i32_58 : i32
      %90 = tpu.assume_multiple %89, 64 : i32
      %c0_59 = arith.constant 0 : index
      %91 = arith.index_cast %90 : i32 to index
      %c0_60 = arith.constant 0 : index
      %92 = vector.load %arg3[%c0_59, %91, %c0_60] : memref<1x64x32xf32, #tpu.memory_space<vmem>>, vector<1x64x32xf32>
      %93 = vector.shape_cast %92 : vector<1x64x32xf32> to vector<64x32xf32>
      %94 = vector.broadcast %81 : vector<1x32xf32> to vector<64x32xf32>
      %95 = arith.mulf %93, %94 : vector<64x32xf32>
      %96 = vector.broadcast %84 : vector<1x32xf32> to vector<64x32xf32>
      %97 = arith.addf %95, %96 : vector<64x32xf32>
      %98 = arith.truncf %97 : vector<64x32xf32> to vector<64x32xbf16>
      %c0_61 = arith.constant 0 : index
      %c0_62 = arith.constant 0 : index
      %99 = vector.load %arg9[%c0_61, %c0_62] : memref<32x32xbf16, #tpu.memory_space<vmem>>, vector<32x32xbf16>
      %cst_63 = arith.constant dense<0.000000e+00> : vector<64x32xf32>
      %100 = tpu.matmul %98, %99, %cst_63 {dimension_numbers = #tpu.dot_dimension_numbers<[1], [0], [0], [1], [0, 0, 1, 1], [], []>} : vector<64x32xbf16>, vector<32x32xbf16>, vector<64x32xf32> -> vector<64x32xf32>
      %c0_64 = arith.constant 0 : index
      %c0_65 = arith.constant 0 : index
      %101 = vector.load %arg10[%c0_64, %c0_65] : memref<1x32xf32, #tpu.memory_space<vmem>>, vector<1x32xf32>
      %102 = vector.broadcast %101 : vector<1x32xf32> to vector<64x32xf32>
      %103 = arith.addf %100, %102 : vector<64x32xf32>
      %104 = arith.truncf %103 : vector<64x32xf32> to vector<64x32xbf16>
      %105 = arith.index_cast %90 : i32 to index
      %c0_66 = arith.constant 0 : index
      %106 = vector.load %arg16[%105, %c0_66] : memref<64x32xbf16, #tpu.memory_space<vmem>>, vector<64x32xbf16>
      tpu.vector_store %arg16[%105, %c0_66], %104 {strides = array<i32>} : memref<64x32xbf16, #tpu.memory_space<vmem>>, vector<64x32xbf16>,
      %c0_67 = arith.constant 0 : index
      %c0_68 = arith.constant 0 : index
      %107 = vector.load %arg11[%c0_67, %c0_68] : memref<32x32xbf16, #tpu.memory_space<vmem>>, vector<32x32xbf16>
      %cst_69 = arith.constant dense<0.000000e+00> : vector<64x32xf32>
      %108 = tpu.matmul %98, %107, %cst_69 {dimension_numbers = #tpu.dot_dimension_numbers<[1], [0], [0], [1], [0, 0, 1, 1], [], []>} : vector<64x32xbf16>, vector<32x32xbf16>, vector<64x32xf32> -> vector<64x32xf32>
      %c0_70 = arith.constant 0 : index
      %c0_71 = arith.constant 0 : index
      %109 = vector.load %arg12[%c0_70, %c0_71] : memref<1x32xf32, #tpu.memory_space<vmem>>, vector<1x32xf32>
      %110 = vector.broadcast %109 : vector<1x32xf32> to vector<64x32xf32>
      %111 = arith.addf %108, %110 : vector<64x32xf32>
      %112 = arith.truncf %111 : vector<64x32xf32> to vector<64x32xbf16>
      %113 = arith.index_cast %90 : i32 to index
      %c0_72 = arith.constant 0 : index
      %114 = vector.load %arg17[%113, %c0_72] : memref<64x32xbf16, #tpu.memory_space<vmem>>, vector<64x32xbf16>
      tpu.vector_store %arg17[%113, %c0_72], %112 {strides = array<i32>} : memref<64x32xbf16, #tpu.memory_space<vmem>>, vector<64x32xbf16>,
      %c1_i32_73 = arith.constant 1 : i32
    } else {
    }
    %c1_i32 = arith.constant 1 : i32
    %3 = arith.muli %arg1, %c1_i32 : i32
    %4 = arith.addi %3, %arg2 : i32
    %c64_i32 = arith.constant 64 : i32
    %5 = arith.muli %4, %c64_i32 : i32
    %6 = tpu.assume_multiple %5, 64 : i32
    %c0 = arith.constant 0 : index
    %7 = arith.index_cast %6 : i32 to index
    %c0_1 = arith.constant 0 : index
    %8 = vector.load %arg3[%c0, %7, %c0_1] : memref<1x64x32xf32, #tpu.memory_space<vmem>>, vector<1x64x32xf32>
    %9 = vector.shape_cast %8 : vector<1x64x32xf32> to vector<64x32xf32>
    %c0_2 = arith.constant 0 : index
    %c0_3 = arith.constant 0 : index
    %10 = vector.load %arg18[%c0_2, %c0_3] : memref<1x32xf32, #tpu.memory_space<vmem>>, vector<1x32xf32>
    %11 = vector.broadcast %10 : vector<1x32xf32> to vector<64x32xf32>
    %12 = arith.mulf %9, %11 : vector<64x32xf32>
    %c0_4 = arith.constant 0 : index
    %c0_5 = arith.constant 0 : index
    %13 = vector.load %arg19[%c0_4, %c0_5] : memref<1x32xf32, #tpu.memory_space<vmem>>, vector<1x32xf32>
    %14 = vector.broadcast %13 : vector<1x32xf32> to vector<64x32xf32>
    %15 = arith.addf %12, %14 : vector<64x32xf32>
    %16 = arith.truncf %15 : vector<64x32xf32> to vector<64x32xbf16>
    %c0_6 = arith.constant 0 : index
    %c0_7 = arith.constant 0 : index
    %17 = vector.load %arg7[%c0_6, %c0_7] : memref<32x32xbf16, #tpu.memory_space<vmem>>, vector<32x32xbf16>
    %cst = arith.constant dense<0.000000e+00> : vector<64x32xf32>
    %18 = tpu.matmul %16, %17, %cst {dimension_numbers = #tpu.dot_dimension_numbers<[1], [0], [0], [1], [0, 0, 1, 1], [], []>} : vector<64x32xbf16>, vector<32x32xbf16>, vector<64x32xf32> -> vector<64x32xf32>
    %c0_8 = arith.constant 0 : index
    %c0_9 = arith.constant 0 : index
    %19 = vector.load %arg8[%c0_8, %c0_9] : memref<1x32xf32, #tpu.memory_space<vmem>>, vector<1x32xf32>
    %20 = vector.broadcast %19 : vector<1x32xf32> to vector<64x32xf32>
    %21 = arith.addf %18, %20 : vector<64x32xf32>
    %22 = arith.truncf %21 : vector<64x32xf32> to vector<64x32xbf16>
    %c0_10 = arith.constant 0 : index
    %c0_11 = arith.constant 0 : index
    %23 = vector.load %arg16[%c0_10, %c0_11] : memref<64x32xbf16, #tpu.memory_space<vmem>>, vector<64x32xbf16>
    %cst_12 = arith.constant dense<0.000000e+00> : vector<64x64xf32>
    %24 = tpu.matmul %22, %23, %cst_12 {dimension_numbers = #tpu.dot_dimension_numbers<[1], [1], [0], [0], [0, 0, 1, 0], [], []>} : vector<64x32xbf16>, vector<64x32xbf16>, vector<64x64xf32> -> vector<64x64xf32>
    %cst_13 = arith.constant dense<0xFF800000> : vector<64xf32>
    %25 = vector.multi_reduction <maximumf>, %24, %cst_13 [1] : vector<64x64xf32> to vector<64xf32>
    %26 = vector.shape_cast %25 : vector<64xf32> to vector<64x1xf32>
    %27 = vector.broadcast %26 : vector<64x1xf32> to vector<64x64xf32>
    %28 = arith.subf %24, %27 : vector<64x64xf32>
    %29 = math.exp %28 : vector<64x64xf32>
    %cst_14 = arith.constant dense<0.000000e+00> : vector<64xf32>
    %30 = vector.multi_reduction <add>, %29, %cst_14 [1] : vector<64x64xf32> to vector<64xf32>
    %31 = vector.shape_cast %30 : vector<64xf32> to vector<64x1xf32>
    %32 = arith.truncf %29 : vector<64x64xf32> to vector<64x64xbf16>
    %c0_15 = arith.constant 0 : index
    %c0_16 = arith.constant 0 : index
    %33 = vector.load %arg17[%c0_15, %c0_16] : memref<64x32xbf16, #tpu.memory_space<vmem>>, vector<64x32xbf16>
    %cst_17 = arith.constant dense<0.000000e+00> : vector<64x32xf32>
    %34 = tpu.matmul %32, %33, %cst_17 {dimension_numbers = #tpu.dot_dimension_numbers<[1], [0], [0], [1], [0, 0, 1, 1], [], []>} : vector<64x64xbf16>, vector<64x32xbf16>, vector<64x32xf32> -> vector<64x32xf32>
    %35 = tpu.reciprocal %31 {approx = true} : vector<64x1xf32> -> vector<64x1xf32>
    %36 = vector.broadcast %35 : vector<64x1xf32> to vector<64x32xf32>
    %37 = arith.mulf %34, %36 : vector<64x32xf32>
    %38 = arith.truncf %37 : vector<64x32xf32> to vector<64x32xbf16>
    %c0_18 = arith.constant 0 : index
    %c0_19 = arith.constant 0 : index
    %39 = vector.load %arg13[%c0_18, %c0_19] : memref<32x32xbf16, #tpu.memory_space<vmem>>, vector<32x32xbf16>
    %cst_20 = arith.constant dense<0.000000e+00> : vector<64x32xf32>
    %40 = tpu.matmul %38, %39, %cst_20 {dimension_numbers = #tpu.dot_dimension_numbers<[1], [0], [0], [1], [0, 0, 1, 1], [], []>} : vector<64x32xbf16>, vector<32x32xbf16>, vector<64x32xf32> -> vector<64x32xf32>
    %41 = arith.addf %9, %40 : vector<64x32xf32>
    %c0_21 = arith.constant 0 : index
    %c0_22 = arith.constant 0 : index
    %42 = vector.load %arg14[%c0_21, %c0_22] : memref<1x32xf32, #tpu.memory_space<vmem>>, vector<1x32xf32>
    %43 = vector.broadcast %42 : vector<1x32xf32> to vector<64x32xf32>
    %44 = arith.addf %41, %43 : vector<64x32xf32>
    %c0_23 = arith.constant 0 : index
    %c0_24 = arith.constant 0 : index
    %c0_25 = arith.constant 0 : index
    %45 = vector.load %arg15[%c0_23, %c0_24, %c0_25] : memref<1x64x32xf32, #tpu.memory_space<vmem>>, vector<1x64x32xf32>
    %46 = vector.shape_cast %45 : vector<1x64x32xf32> to vector<64x32xf32>
    %47 = vector.shape_cast %44 : vector<64x32xf32> to vector<1x64x32xf32>
    tpu.vector_store %arg15[%c0_23, %c0_24, %c0_25], %47 {strides = array<i32>} : memref<1x64x32xf32, #tpu.memory_space<vmem>>, vector<1x64x32xf32>,
    return
  }
  func.func @transform_0(%arg0: i32, %arg1: i32, %arg2: i32) -> (i32, i32, i32) {
    %c0_i32 = arith.constant 0 : i32
    %c0_i32_0 = arith.constant 0 : i32
    %c0_i32_1 = arith.constant 0 : i32
    return %arg0, %c0_i32, %c0_i32_0 : i32, i32, i32
  }
  func.func @transform_1(%arg0: i32, %arg1: i32, %arg2: i32) -> (i32, i32) {
    %c0_i32 = arith.constant 0 : i32
    %c0_i32_0 = arith.constant 0 : i32
    %c0_i32_1 = arith.constant 0 : i32
    return %c0_i32, %c0_i32_0 : i32, i32
  }
  func.func @transform_2(%arg0: i32, %arg1: i32, %arg2: i32) -> (i32, i32) {
    %c0_i32 = arith.constant 0 : i32
    %c0_i32_0 = arith.constant 0 : i32
    %c0_i32_1 = arith.constant 0 : i32
    return %c0_i32, %c0_i32_0 : i32, i32
  }
  func.func @transform_3(%arg0: i32, %arg1: i32, %arg2: i32) -> (i32, i32) {
    %c0_i32 = arith.constant 0 : i32
    %c0_i32_0 = arith.constant 0 : i32
    %c0_i32_1 = arith.constant 0 : i32
    return %c0_i32, %c0_i32_0 : i32, i32
  }
  func.func @transform_4(%arg0: i32, %arg1: i32, %arg2: i32) -> (i32, i32) {
    %c0_i32 = arith.constant 0 : i32
    %c0_i32_0 = arith.constant 0 : i32
    %c0_i32_1 = arith.constant 0 : i32
    return %c0_i32, %c0_i32_0 : i32, i32
  }
  func.func @transform_5(%arg0: i32, %arg1: i32, %arg2: i32) -> (i32, i32) {
    %c0_i32 = arith.constant 0 : i32
    %c0_i32_0 = arith.constant 0 : i32
    %c0_i32_1 = arith.constant 0 : i32
    return %c0_i32, %c0_i32_0 : i32, i32
  }
  func.func @transform_6(%arg0: i32, %arg1: i32, %arg2: i32) -> (i32, i32) {
    %c0_i32 = arith.constant 0 : i32
    %c0_i32_0 = arith.constant 0 : i32
    %c0_i32_1 = arith.constant 0 : i32
    return %c0_i32, %c0_i32_0 : i32, i32
  }
  func.func @transform_7(%arg0: i32, %arg1: i32, %arg2: i32) -> (i32, i32) {
    %c0_i32 = arith.constant 0 : i32
    %c0_i32_0 = arith.constant 0 : i32
    %c0_i32_1 = arith.constant 0 : i32
    return %c0_i32, %c0_i32_0 : i32, i32
  }
  func.func @transform_8(%arg0: i32, %arg1: i32, %arg2: i32) -> (i32, i32) {
    %c0_i32 = arith.constant 0 : i32
    %c0_i32_0 = arith.constant 0 : i32
    %c0_i32_1 = arith.constant 0 : i32
    return %c0_i32, %c0_i32_0 : i32, i32
  }
  func.func @transform_9(%arg0: i32, %arg1: i32, %arg2: i32) -> (i32, i32) {
    %c0_i32 = arith.constant 0 : i32
    %c0_i32_0 = arith.constant 0 : i32
    %c0_i32_1 = arith.constant 0 : i32
    return %c0_i32, %c0_i32_0 : i32, i32
  }
  func.func @transform_10(%arg0: i32, %arg1: i32, %arg2: i32) -> (i32, i32) {
    %c0_i32 = arith.constant 0 : i32
    %c0_i32_0 = arith.constant 0 : i32
    %c0_i32_1 = arith.constant 0 : i32
    return %c0_i32, %c0_i32_0 : i32, i32
  }
  func.func @transform_11(%arg0: i32, %arg1: i32, %arg2: i32) -> (i32, i32) {
    %c0_i32 = arith.constant 0 : i32
    %c0_i32_0 = arith.constant 0 : i32
    %c0_i32_1 = arith.constant 0 : i32
    return %c0_i32, %c0_i32_0 : i32, i32
  }
  func.func @transform_12(%arg0: i32, %arg1: i32, %arg2: i32) -> (i32, i32, i32) {
    %c1_i32 = arith.constant 1 : i32
    %0 = arith.muli %arg1, %c1_i32 : i32
    %1 = arith.addi %0, %arg2 : i32
    %c0_i32 = arith.constant 0 : i32
    %c0_i32_0 = arith.constant 0 : i32
    return %arg0, %1, %c0_i32 : i32, i32, i32
  }
}

</mosaic_0001>

<bundles_post_ra>
// kernel: tpu_custom_call.1
= control target key start
LH: loop header
LB: loop body
LE: loop exit
PB: predicated region body
PF: predicated region fallthrough
CT: control target
= control target key end

     0   :  { %s2112_s21 = smov 0   ;;  %s2114_s22 = smov 0   ;;  %s2357_s0 = inlined_call_operand.vmem [shape: f32[2,64,32], index: 0, kind: input, shape index: {}]   ;;  %s2358_s1 = inlined_call_operand.vmem [shape: f32[1,32], index: 1, kind: input, shape index: {}]   ;;  %s2359_s2 = inlined_call_operand.vmem [shape: f32[1,32], index: 2, kind: input, shape index: {}]   ;;  %s2360_s3 = inlined_call_operand.vmem [shape: bf16[32,32], index: 3, kind: input, shape index: {}]   ;;  %s2361_s4 = inlined_call_operand.vmem [shape: bf16[32,32], index: 4, kind: input, shape index: {}]   ;;  %s2362_s5 = inlined_call_operand.vmem [shape: f32[1,32], index: 5, kind: input, shape index: {}]   ;;  %s2363_s6 = inlined_call_operand.vmem [shape: bf16[32,32], index: 6, kind: input, shape index: {}]   ;;  %s2364_s7 = inlined_call_operand.vmem [shape: f32[1,32], index: 7, kind: input, shape index: {}]   ;;  %s2365_s8 = inlined_call_operand.vmem [shape: bf16[32,32], index: 8, kind: input, shape index: {}]   ;;  %s2366_s9 = inlined_call_operand.vmem [shape: f32[1,32], index: 9, kind: input, shape index: {}]   ;;  %s2367_s10 = inlined_call_operand.vmem [shape: bf16[32,32], index: 10, kind: input, shape index: {}]   ;;  %s2368_s11 = inlined_call_operand.vmem [shape: f32[1,32], index: 11, kind: input, shape index: {}]   ;;  %s2369_s12 = inlined_call_operand.vmem [shape: f32[2,64,32], index: 12, kind: output, shape index: {}]  }
   0x1   :  { %s2116_s23 = smov 0  }
   0x2 LB: > { %s41_s24 = sadd.s32 1, %s2039_s22  ;;  %p1691_p0 = scmp.ge.s32.totalorder %s2043_s23, 1  ;;  %s2043_s23 = sphi %s2116_s23, %s22_s23   ;;  %s2039_s22 = sphi %s2114_s22, %s2371_s22   ;;  %s2035_s21 = sphi %s2112_s21, %s2370_s21  }
   0x3   : > { %p43_p1 = scmp.ge.s32.totalorder %s41_s24, 2  ;;  %p385_p2 = scmp.lt.s32.totalorder %s2043_s23, 3 }
   0x5   : > { %s2373_s24 = smov (%p43_p1, %s41_s24), 0  ;;  %p386_p3 = pnand %p1691_p0, %p385_p2 }
   0x6   : > { %p432_p4 = scmp.lt.s32.totalorder (!%p386_p3), %s2035_s21, 1 }
   0x7   : > { %389 = sbr.rel (%p386_p3) target bundleno = 1522 (0x5f2), region = 68 }
   0xc   : > { %v1788_v0 = vld [vmem:[%s2360_s3 + $0x8] sm:$0xff]   ;;  %v1781_v1 = vld [vmem:[%s2360_s3] sm:$0xff]   ;;  %v2045_v2 = vmov 0.0   ;;  %vm2046_vm0 = vmmov 0   ;;  %s2375_s21 = smov (!%p432_p4, %s2035_s21), 1  ;;  %vm470_vm1 = vcmask 261120   ;;  %v567_v36 = vlaneseq }
   0xd   : > { %1839 = vmatprep.subr.mxu1 %v2045_v2  ;;  %v1786_v3 = vunpack.c.l.bf16 %v1788_v0  ;;  %v1787_v4 = vunpack.c.h.bf16 %v1788_v0  ;;  %1847 = vmatprep.mubr.msk.f32.mxu1 %vm2046_vm0, %v2045_v2  ;;  %v1783_v5 = vunpack.c.h.bf16 %v1781_v1  ;;  %s1762_s29 = sshll.u32 %s2375_s21, 6  ;;  %v1782_v6 = vunpack.c.l.bf16 %v1781_v1 }
   0xe   : > { %s436_s14 = scalar_lea.vmem %s2357_s0, %s1762_s29  ;;  %v568_v37 = vshrl.u32 %v567_v36, 7  ;;  %vm690_vm2 = vcmask 253952   ;;  %v687_v36 = vld [vmem:[%s2359_s2] sm:$0x1]  ;;  %vm863_vm3 = vcmask 257024   ;;  %vm1267_vm4 = vcmask 523264   ;;  %s446_s19 = scalar_lea.vmem %s2369_s12, %s1762_s29 }
   0xf   : > { %1840 = vmatpush3.msra.mxu1 %v1787_v4  ;;  %v2145_v7 = vld [vmem:[%s436_s14] sm:$0xff]  ;;  %v2147_v8 = vld [vmem:[%s436_s14 + $0x8] sm:$0xff]  ;;  %v2149_v9 = vld [vmem:[%s436_s14 + $0x10] sm:$0xff] }
  0x10   : > { %1841 = vmatprep.subr.mxu1 %v2045_v2  ;;  %v2151_v10 = vld [vmem:[%s436_s14 + $0x18] sm:$0xff]  ;;  %v471_v11 = vsel %vm470_vm1, %v2145_v7, 0.0  ;;  %v472_v12 = vsel %vm470_vm1, %v2147_v8, 0.0  ;;  %v474_v13 = vsel %vm470_vm1, %v2149_v9, 0.0  ;;  %v2159_v14 = vld [vmem:[%s436_s14 + $0x20] sm:$0xff]  ;;  %v2163_v17 = vld [vmem:[%s436_s14 + $0x28] sm:$0xff] }
  0x11   : > { %1842 = vmatpush3.msra.mxu1 %v1786_v3  ;;  %v473_v15 = vadd.f32 %v472_v12, %v471_v11  ;;  %v476_v16 = vsel %vm470_vm1, %v2151_v10, 0.0  ;;  %v478_v19 = vsel %vm470_vm1, %v2159_v14, 0.0  ;;  %v2167_v20 = vld [vmem:[%s436_s14 + $0x30] sm:$0xff]  ;;  %v480_v22 = vsel %vm470_vm1, %v2163_v17, 0.0  ;;  %v2171_v23 = vld [vmem:[%s436_s14 + $0x38] sm:$0xff] }
  0x12   : > { %1843 = vmatprep.subr.mxu1 %v2045_v2  ;;  %v482_v25 = vsel %vm470_vm1, %v2167_v20, 0.0  ;;  %v484_v27 = vsel %vm470_vm1, %v2171_v23, 0.0  ;;  %v2179_v38 = vsub.s32 0, %v568_v37 }
  0x13   : > { %1844 = vmatpush3.msra.mxu1 %v1783_v5  ;;  %v475_v18 = vadd.f32 %v474_v13, %v473_v15 }
  0x14   : > { %1845 = vmatprep.subr.mxu1 %v2045_v2 }
  0x15   : > { %1846 = vmatpush3.msra.mxu1 %v1782_v6  ;;  %v477_v21 = vadd.f32 %v476_v16, %v475_v18 }
  0x16   : > { %1850 = vmatprep.subr.mxu1 %v2045_v2 }
  0x17   : > { %v479_v24 = vadd.f32 %v478_v19, %v477_v21 }
  0x19   : > { %v481_v26 = vadd.f32 %v480_v22, %v479_v24  ;;  %v1971_v24 = vld [vmem:[%s2363_s6 + $0x8] sm:$0xff]  }
  0x1a   : > { %1861 = vmatprep.subr.bf16.mxu0 %v1971_v24 }
  0x1b   : > { %v483_v28 = vadd.f32 %v482_v25, %v481_v26  ;;  %v1972_v25 = vld [vmem:[%s2365_s8 + $0x8] sm:$0xff]   ;;  %v1973_v26 = vld [vmem:[%s2363_s6] sm:$0xff]   ;;  %1862 = vmatpush3.bf16.msra.mxu0 %v1971_v24 }
  0x1c   : > { %1863 = vmatprep.subr.bf16.mxu0 %v1973_v26 }
  0x1d   : > { %v485_v29 = vadd.f32 %v484_v27, %v483_v28  ;;  %v1974_v27 = vld [vmem:[%s2365_s8] sm:$0xff]   ;;  %v1975_v28 = vld [vmem:[%s2361_s4 + $0x8] sm:$0xff]  }
  0x1f   : > { %v486_v30 = vrot.slane %v485_v29, 4  ;;  %1864 = vmatpush3.bf16.msra.mxu0 %v1973_v26 }
  0x20   : > { %1885 = vmatprep.subr.bf16.mxu0 %v1975_v28 }
  0x21   : > { %v487_v31 = vadd.f32 %v486_v30, %v485_v29 }
  0x23   : > { %v488_v32 = vrot.slane %v487_v31, 2 }
  0x25   : > { %v489_v33 = vadd.f32 %v488_v32, %v487_v31 }
  0x27   : > { %v490_v34 = vrot.slane %v489_v33, 1 }
  0x29   : > { %v491_v35 = vadd.f32 %v490_v34, %v489_v33  ;;  %v685_v33 = vld [vmem:[%s2358_s1] sm:$0x1] }
  0x2b   : > { %1848 = vmatmul.mubr.msk.f32.vlgmr.msra.gmra.mxu1 %vm470_vm1, %v491_v35 }
  0x2c   : > { %1851 = vmatpush3.msra.mxu1 %v1787_v4  ;;  %1858 = vmatprep.mubr.msk.f32.mxu1 %vm2046_vm0, %v2045_v2 }
  0x2d   : > { %1852 = vmatprep.subr.mxu1 %v2045_v2 }
  0x2e   : > { %1853 = vmatpush3.msra.mxu1 %v1786_v3 }
  0x2f   : > { %1854 = vmatprep.subr.mxu1 %v2045_v2 }
  0x30   : > { %1855 = vmatpush3.msra.mxu1 %v1783_v5 }
  0x31   : > { %1856 = vmatprep.subr.mxu1 %v2045_v2 }
  0x32   : > { %1857 = vmatpush3.msra.mxu1 %v1782_v6 }
  0x33   : > { %1873 = vmatprep.subr.bf16.mxu1 %v1972_v25 }
  0xeb   : > { %v562_v39 = vpop.f32.mrf.mxu1 }
  0xec   : > { %v2181_v40 = vmul.f32 0.015625, %v562_v39 }
  0xed   : > { %v1849_v41 = vpop.f32.mrf.mxu1 }
  0xee   : > { %v570_v42 = vrot.slane %v2181_v40, %v2179_v38 }
  0xf0   : > { %v571_v43 = vsub.f32 %v2145_v7, %v570_v42  ;;  %v572_v44 = vsub.f32 %v2147_v8, %v570_v42  ;;  %v573_v45 = vsub.f32 %v2149_v9, %v570_v42  ;;  %v574_v46 = vsub.f32 %v2151_v10, %v570_v42 }
  0xf1   : > { %v575_v47 = vsub.f32 %v2159_v14, %v570_v42  ;;  %v576_v51 = vsub.f32 %v2163_v17, %v570_v42  ;;  %v577_v56 = vsub.f32 %v2167_v20, %v570_v42  ;;  %v578_v60 = vsub.f32 %v2171_v23, %v570_v42 }
  0xf2   : > { %v579_v48 = vmul.f32 %v571_v43, %v571_v43  ;;  %v580_v49 = vmul.f32 %v572_v44, %v572_v44  ;;  %v581_v50 = vmul.f32 %v573_v45, %v573_v45  ;;  %v582_v52 = vmul.f32 %v574_v46, %v574_v46 }
  0xf3   : > { %v583_v57 = vmul.f32 %v575_v47, %v575_v47  ;;  %v584_v61 = vmul.f32 %v576_v51, %v576_v51  ;;  %v585_v0 = vmul.f32 %v577_v56, %v577_v56  ;;  %v586_v3 = vmul.f32 %v578_v60, %v578_v60 }
  0xf4   : > { %v587_v53 = vsel %vm470_vm1, %v579_v48, 0.0  ;;  %v588_v54 = vsel %vm470_vm1, %v580_v49, 0.0  ;;  %v590_v58 = vsel %vm470_vm1, %v581_v50, 0.0  ;;  %v592_v62 = vsel %vm470_vm1, %v582_v52, 0.0 }
  0xf5   : > { %v589_v55 = vadd.f32 %v588_v54, %v587_v53  ;;  %v594_v1 = vsel %vm470_vm1, %v583_v57, 0.0  ;;  %v596_v4 = vsel %vm470_vm1, %v584_v61, 0.0  ;;  %v598_v6 = vsel %vm470_vm1, %v585_v0, 0.0  ;;  %v1976_v57 = vld [vmem:[%s2361_s4] sm:$0xff]  }
  0xf6   : > { %v600_v12 = vsel %vm470_vm1, %v586_v3, 0.0 }
  0xf7   : > { %v591_v59 = vadd.f32 %v590_v58, %v589_v55 }
  0xf9   : > { %v593_v63 = vadd.f32 %v592_v62, %v591_v59 }
  0xfb   : > { %v595_v2 = vadd.f32 %v594_v1, %v593_v63 }
  0xfd   : > { %v597_v5 = vadd.f32 %v596_v4, %v595_v2 }
  0xff   : > { %v599_v11 = vadd.f32 %v598_v6, %v597_v5 }
 0x101   : > { %v601_v13 = vadd.f32 %v600_v12, %v599_v11 }
 0x103   : > { %v602_v15 = vrot.slane %v601_v13, 4 }
 0x105   : > { %v603_v16 = vadd.f32 %v602_v15, %v601_v13 }
 0x107   : > { %v604_v18 = vrot.slane %v603_v16, 2 }
 0x109   : > { %v605_v19 = vadd.f32 %v604_v18, %v603_v16 }
 0x10b   : > { %v606_v21 = vrot.slane %v605_v19, 1 }
 0x10d   : > { %v607_v22 = vadd.f32 %v606_v21, %v605_v19 }
 0x10f   : > { %1859 = vmatmul.mubr.msk.f32.vlgmr.msra.gmra.mxu1 %vm470_vm1, %v607_v22 }
 0x110   : > { %1874 = vmatpush3.bf16.msra.mxu1 %v1972_v25 }
 0x111   : > { %1875 = vmatprep.subr.bf16.mxu1 %v1974_v27 }
 0x114   : > { %1876 = vmatpush3.bf16.msra.mxu1 %v1974_v27 }
 0x1cf   : > { %v678_v29 = vpop.f32.mrf.mxu1 }
 0x1d0   : > { %v682_v30 = vmul.f32 0.015625, %v678_v29  ;;  %v1713_v29 = vld [vmem:[%s2366_s9] ss:$0 sm:$0xff] }
 0x1d1   : > { %v1860_v31 = vpop.f32.mrf.mxu1 }
 0x1d2   : > { %v683_v32 = vadd.f32 1e-05, %v682_v30 }
 0x1d4   : > { %1987 = vrsqrt.f32 %v683_v32 }
 0x1e1   : > { %v1988_v34 = vpop.eup %1987 }
 0x1e2   : > { %v686_v35 = vmul.f32 %v1988_v34, %v685_v33 }
 0x1e4   : > { %v688_v37 = vmul.f32 %v686_v35, %v2181_v40  ;;  %691 = vst.msk [vmem:[#allocation4] sm:$0x1] %vm690_vm2, %v686_v35  ;;  %v704_v39 = vrot.slane %v686_v35, %v2179_v38 }
 0x1e6   : > { %v689_v41 = vsub.f32 %v687_v36, %v688_v37  ;;  %v705_v42 = vmul.f32 %v704_v39, %v2145_v7  ;;  %v706_v44 = vmul.f32 %v704_v39, %v2147_v8  ;;  %v707_v45 = vmul.f32 %v704_v39, %v2149_v9 }
 0x1e7   : > { %v708_v46 = vmul.f32 %v704_v39, %v2151_v10  ;;  %v709_v47 = vmul.f32 %v704_v39, %v2159_v14  ;;  %v710_v48 = vmul.f32 %v704_v39, %v2163_v17  ;;  %v711_v58 = vmul.f32 %v704_v39, %v2167_v20 }
 0x1e8   : > { %692 = vst.msk [vmem:[#allocation5] sm:$0x1] %vm690_vm2, %v689_v41  ;;  %v717_v43 = vrot.slane %v689_v41, %v2179_v38  ;;  %v712_v59 = vmul.f32 %v704_v39, %v2171_v23 }
 0x1ea   : > { %v719_v40 = vadd.f32 %v717_v43, %v705_v42  ;;  %v720_v49 = vadd.f32 %v717_v43, %v706_v44  ;;  %v721_v50 = vadd.f32 %v717_v43, %v707_v45  ;;  %v722_v51 = vadd.f32 %v717_v43, %v708_v46 }
 0x1eb   : > { %v723_v52 = vadd.f32 %v717_v43, %v709_v47  ;;  %v724_v53 = vadd.f32 %v717_v43, %v710_v48  ;;  %v1728_v56 = vld [vmem:[#allocation4] ss:$0 sm:$0xff]  ;;  %v725_v63 = vadd.f32 %v717_v43, %v711_v58  ;;  %v726_v0 = vadd.f32 %v717_v43, %v712_v59 }
 0x1ec   : > { %v727_v54 = vpack.c.bf16 %v720_v49, %v719_v40  ;;  %v728_v55 = vpack.c.bf16 %v722_v51, %v721_v50  ;;  %v1018_v61 = vmul.f32 %v1728_v56, %v2145_v7  ;;  %v1019_v62 = vmul.f32 %v1728_v56, %v2147_v8 }
 0x1ed   : > { %v729_v38 = vpack.c.bf16 %v724_v53, %v723_v52  ;;  %v730_v3 = vpack.c.bf16 %v726_v0, %v725_v63  ;;  %v1020_v5 = vmul.f32 %v1728_v56, %v2149_v9  ;;  %v1021_v6 = vmul.f32 %v1728_v56, %v2151_v10 }
 0x1ee   : > { %1865 = vmatprep.mubr.msk.bf16.mxu0 %vm470_vm1, %v727_v54  ;;  %1877 = vmatprep.mubr.msk.bf16.mxu1 %vm470_vm1, %v727_v54  ;;  %v1022_v11 = vmul.f32 %v1728_v56, %v2159_v14  ;;  %v1023_v12 = vmul.f32 %v1728_v56, %v2163_v17  ;;  %v1024_v22 = vmul.f32 %v1728_v56, %v2167_v20 }
 0x1ef   : > { %1866 = vmatmul.mubr.msk.bf16.vlgmr.msra.gmra.mxu0 %vm470_vm1, %v728_v55  ;;  %1878 = vmatmul.mubr.msk.bf16.vlgmr.msra.gmra.mxu1 %vm470_vm1, %v728_v55  ;;  %v1729_v60 = vld [vmem:[#allocation5] ss:$0 sm:$0xff]  ;;  %v1025_v24 = vmul.f32 %v1728_v56, %v2171_v23 }
 0x1f0   : > { %1869 = vmatprep.mubr.msk.bf16.mxu0 %vm470_vm1, %v729_v38  ;;  %1881 = vmatprep.mubr.msk.bf16.mxu1 %vm470_vm1, %v729_v38  ;;  %v1033_v1 = vadd.f32 %v1729_v60, %v1018_v61  ;;  %v1034_v2 = vadd.f32 %v1729_v60, %v1019_v62  ;;  %v1035_v13 = vadd.f32 %v1729_v60, %v1020_v5 }
 0x1f1   : > { %1886 = vmatpush3.bf16.msra.mxu0 %v1975_v28  ;;  %v1036_v15 = vadd.f32 %v1729_v60, %v1021_v6  ;;  %v1037_v16 = vadd.f32 %v1729_v60, %v1022_v11  ;;  %v1038_v18 = vadd.f32 %v1729_v60, %v1023_v12  ;;  %v1039_v25 = vadd.f32 %v1729_v60, %v1024_v22  ;;  %v1698_v28 = vld [vmem:[%s2364_s7] ss:$0 sm:$0xff] }
 0x1f2   : > { %1887 = vmatprep.subr.bf16.mxu0 %v1976_v57  ;;  %v1041_v4 = vpack.c.bf16 %v1034_v2, %v1033_v1  ;;  %v1040_v26 = vadd.f32 %v1729_v60, %v1025_v24 }
 0x1f3   : > { %v1042_v19 = vpack.c.bf16 %v1036_v15, %v1035_v13  ;;  %v1043_v21 = vpack.c.bf16 %v1038_v18, %v1037_v16 }
 0x1f4   : > { %v1044_v27 = vpack.c.bf16 %v1040_v26, %v1039_v25  ;;  %v1730_v25 = vld [vmem:[%s2362_s5] ss:$0 sm:$0xff] }
 0x1f5   : > { %1888 = vmatpush3.bf16.msra.mxu0 %v1976_v57 }
 0x1f7   : > { %1870 = vmatmul.mubr.msk.bf16.gmra.mxu0 %vm470_vm1, %v730_v3  ;;  %1882 = vmatmul.mubr.msk.bf16.gmra.mxu1 %vm470_vm1, %v730_v3 }
 0x1f8   : > { %1889 = vmatprep.mubr.msk.bf16.mxu0 %vm470_vm1, %v1041_v4 }
 0x1ff   : > { %1890 = vmatmul.mubr.msk.bf16.vlgmr.msra.gmra.mxu0 %vm470_vm1, %v1042_v19 }
 0x200   : > { %1893 = vmatprep.mubr.msk.bf16.mxu0 %vm470_vm1, %v1043_v21 }
 0x207   : > { %1894 = vmatmul.mubr.msk.bf16.gmra.mxu0 %vm470_vm1, %v1044_v27 }
 0x2af   : > { %v1867_v30 = vpop.f32.mrf.mxu0  ;;  %v1879_v31 = vpop.f32.mrf.mxu1 }
 0x2b0   : > { %v809_v32 = vadd.f32 %v1867_v30, %v1698_v28  ;;  %v938_v33 = vadd.f32 %v1879_v31, %v1713_v29 }
 0x2b1   : > { %v800_v34 = vpop.f32.mrf.mxu0  ;;  %v929_v35 = vpop.f32.mrf.mxu1 }
 0x2b2   : > { %v1766_v36 = vpack.c.bf16 %v809_v32, %v809_v32  ;;  %v1774_v37 = vpack.c.bf16 %v938_v33, %v938_v33  ;;  %v801_v39 = vadd.f32 %v1698_v28, %v800_v34  ;;  %v930_v41 = vadd.f32 %v1713_v29, %v929_v35 }
 0x2b3   : > { %v1868_v42 = vpop.f32.mrf.mxu0  ;;  %v1880_v43 = vpop.f32.mrf.mxu1 }
 0x2b4   : > { %866 = vst.msk [vmem:[#allocation2 + $0x8] sm:$0xf] %vm863_vm3, %v1766_v36  ;;  %994 = vst.msk [vmem:[#allocation3 + $0x8] sm:$0xf] %vm863_vm3, %v1774_v37  ;;  %v1764_v44 = vpack.c.bf16 %v801_v39, %v801_v39  ;;  %v1772_v45 = vpack.c.bf16 %v930_v41, %v930_v41  ;;  %v812_v46 = vadd.f32 %v1868_v42, %v1698_v28 }
 0x2b5   : > { %v941_v47 = vadd.f32 %v1880_v43, %v1713_v29  ;;  %v803_v48 = vpop.f32.mrf.mxu0  ;;  %v932_v40 = vpop.f32.mrf.mxu1 }
 0x2b6   : > { %864 = vst.msk [vmem:[#allocation2] sm:$0xf] %vm863_vm3, %v1764_v44  ;;  %992 = vst.msk [vmem:[#allocation3] sm:$0xf] %vm863_vm3, %v1772_v45  ;;  %v1767_v49 = vpack.c.bf16 %v812_v46, %v812_v46  ;;  %v804_v51 = vadd.f32 %v1698_v28, %v803_v48  ;;  %v933_v52 = vadd.f32 %v1713_v29, %v932_v40 }
 0x2b7   : > { %v1775_v50 = vpack.c.bf16 %v941_v47, %v941_v47  ;;  %v1871_v53 = vpop.f32.mrf.mxu0  ;;  %v1883_v54 = vpop.f32.mrf.mxu1 }
 0x2b8   : > { %867 = vst.msk [vmem:[#allocation2 + $0xc] sm:$0xf] %vm863_vm3, %v1767_v49  ;;  %v1765_v55 = vpack.c.bf16 %v804_v51, %v804_v51  ;;  %v1773_v56 = vpack.c.bf16 %v933_v52, %v933_v52  ;;  %v825_v38 = vadd.f32 %v1871_v53, %v1698_v28  ;;  %v954_v57 = vadd.f32 %v1883_v54, %v1713_v29 }
 0x2b9   : > { %995 = vst.msk [vmem:[#allocation3 + $0xc] sm:$0xf] %vm863_vm3, %v1775_v50  ;;  %v816_v58 = vpop.f32.mrf.mxu0  ;;  %v945_v59 = vpop.f32.mrf.mxu1 }
 0x2ba   : > { %865 = vst.msk [vmem:[#allocation2 + $0x4] sm:$0xf] %vm863_vm3, %v1765_v55  ;;  %993 = vst.msk [vmem:[#allocation3 + $0x4] sm:$0xf] %vm863_vm3, %v1773_v56  ;;  %v1770_v60 = vpack.c.bf16 %v825_v38, %v825_v38  ;;  %v1778_v61 = vpack.c.bf16 %v954_v57, %v954_v57  ;;  %v817_v62 = vadd.f32 %v1698_v28, %v816_v58 }
 0x2bb   : > { %v946_v63 = vadd.f32 %v1713_v29, %v945_v59  ;;  %v1872_v0 = vpop.f32.mrf.mxu0  ;;  %v1884_v1 = vpop.f32.mrf.mxu1 }
 0x2bc   : > { %870 = vst.msk [vmem:[#allocation2 + $0x18] sm:$0xf] %vm863_vm3, %v1770_v60  ;;  %998 = vst.msk [vmem:[#allocation3 + $0x18] sm:$0xf] %vm863_vm3, %v1778_v61  ;;  %v1768_v2 = vpack.c.bf16 %v817_v62, %v817_v62  ;;  %v828_v4 = vadd.f32 %v1872_v0, %v1698_v28  ;;  %v957_v5 = vadd.f32 %v1884_v1, %v1713_v29 }
 0x2bd   : > { %v1776_v3 = vpack.c.bf16 %v946_v63, %v946_v63  ;;  %v819_v6 = vpop.f32.mrf.mxu0  ;;  %v948_v11 = vpop.f32.mrf.mxu1 }
 0x2be   : > { %868 = vst.msk [vmem:[#allocation2 + $0x10] sm:$0xf] %vm863_vm3, %v1768_v2  ;;  %v1771_v12 = vpack.c.bf16 %v828_v4, %v828_v4  ;;  %v1779_v13 = vpack.c.bf16 %v957_v5, %v957_v5  ;;  %v820_v15 = vadd.f32 %v1698_v28, %v819_v6  ;;  %v949_v16 = vadd.f32 %v1713_v29, %v948_v11 }
 0x2bf   : > { %996 = vst.msk [vmem:[#allocation3 + $0x10] sm:$0xf] %vm863_vm3, %v1776_v3  ;;  %v1891_v18 = vpop.f32.mrf.mxu0  ;;  %v1982_v37 = vld [vmem:[#allocation2 + $0x8] sm:$0xff]  }
 0x2c0   : > { %871 = vst.msk [vmem:[#allocation2 + $0x1c] sm:$0xf] %vm863_vm3, %v1771_v12  ;;  %999 = vst.msk [vmem:[#allocation3 + $0x1c] sm:$0xf] %vm863_vm3, %v1779_v13  ;;  %v1769_v19 = vpack.c.bf16 %v820_v15, %v820_v15  ;;  %v1777_v21 = vpack.c.bf16 %v949_v16, %v949_v16  ;;  %v1981_v35 = vld [vmem:[#allocation3 + $0x8] sm:$0xff]   ;;  %v1194_v43 = vsel %vm470_vm1, %v1982_v37, 0  ;;  %v1124_v49 = vadd.f32 %v1891_v18, %v1730_v25 }
 0x2c1   : > { %v1115_v22 = vpop.f32.mrf.mxu0  ;;  %v1983_v39 = vld [vmem:[#allocation3] sm:$0xff]  }
 0x2c2   : > { %869 = vst.msk [vmem:[#allocation2 + $0x14] sm:$0xf] %vm863_vm3, %v1769_v19  ;;  %997 = vst.msk [vmem:[#allocation3 + $0x14] sm:$0xf] %vm863_vm3, %v1777_v21  ;;  %v1116_v27 = vadd.f32 %v1730_v25, %v1115_v22  ;;  %v1984_v44 = vld [vmem:[#allocation2] sm:$0xff]  }
 0x2c3   : > { %v1892_v24 = vpop.f32.mrf.mxu0  ;;  %v1191_v47 = vsel %vm470_vm1, %v1984_v44, 0 }
 0x2c4   : > { %v1127_v48 = vadd.f32 %v1892_v24, %v1730_v25 }
 0x2c5   : > { %v1118_v26 = vpop.f32.mrf.mxu0 }
 0x2c6   : > { %v1119_v28 = vadd.f32 %v1730_v25, %v1118_v26  ;;  %v1147_v51 = vpack.c.bf16 %v1127_v48, %v1124_v49 }
 0x2c7   : > { %v1977_v29 = vld [vmem:[#allocation2 + $0x18] sm:$0xff]   ;;  %v1895_v41 = vpop.f32.mrf.mxu0 }
 0x2c8   : > { %v1146_v30 = vpack.c.bf16 %v1119_v28, %v1116_v27  ;;  %v1978_v31 = vld [vmem:[#allocation3 + $0x18] sm:$0xff]   ;;  %1941 = vmatprep.subr.msk.bf16.mxu1 %vm470_vm1, %v1977_v29  ;;  %v1200_v32 = vsel %vm470_vm1, %v1977_v29, 0  ;;  %v1140_v54 = vadd.f32 %v1895_v41, %v1730_v25 }
 0x2c9   : > { %v1979_v33 = vld [vmem:[#allocation2 + $0x10] sm:$0xff]   ;;  %1913 = vmatprep.subr.bf16.mxu0 %v1978_v31  ;;  %1898 = vmatpush3.bf16.xpose.msra.mxu1 %v1200_v32  ;;  %v1131_v42 = vpop.f32.mrf.mxu0 }
 0x2ca   : > { %1905 = vmatprep.mubr.msk.bf16.mxu1 %vm470_vm1, %v1146_v30  ;;  %v1980_v34 = vld [vmem:[#allocation3 + $0x10] sm:$0xff]   ;;  %1914 = vmatpush3.bf16.msra.mxu0 %v1978_v31  ;;  %v1197_v36 = vsel %vm470_vm1, %v1979_v33, 0  ;;  %v1132_v50 = vadd.f32 %v1730_v25, %v1131_v42 }
 0x2cb   : > { %1942 = vmatprep.subr.msk.bf16.mxu1 %vm470_vm1, %v1979_v33  ;;  %1915 = vmatprep.subr.bf16.mxu0 %v1980_v34  ;;  %v1896_v45 = vpop.f32.mrf.mxu0 }
 0x2cc   : > { %v1143_v53 = vadd.f32 %v1896_v45, %v1730_v25 }
 0x2cd   : > { %v1134_v46 = vpop.f32.mrf.mxu0 }
 0x2ce   : > { %1916 = vmatpush3.bf16.msra.mxu0 %v1980_v34  ;;  %v1135_v40 = vadd.f32 %v1730_v25, %v1134_v46  ;;  %v1149_v55 = vpack.c.bf16 %v1143_v53, %v1140_v54 }
 0x2cf   : > { %1917 = vmatprep.subr.bf16.mxu0 %v1981_v35 }
 0x2d0   : > { %v1148_v52 = vpack.c.bf16 %v1135_v40, %v1132_v50 }
 0x2d1   : > { %1900 = vmatpush3.bf16.xpose.msra.mxu1 %v1197_v36 }
 0x2d2   : > { %1918 = vmatpush3.bf16.msra.mxu0 %v1981_v35  ;;  %1943 = vmatprep.subr.msk.bf16.mxu1 %vm470_vm1, %v1982_v37 }
 0x2d3   : > { %1919 = vmatprep.subr.bf16.mxu0 %v1983_v39 }
 0x2d6   : > { %1920 = vmatpush3.bf16.msra.mxu0 %v1983_v39 }
 0x2d9   : > { %1902 = vmatpush3.bf16.xpose.msra.mxu1 %v1194_v43 }
 0x2da   : > { %1944 = vmatprep.subr.msk.bf16.mxu1 %vm470_vm1, %v1984_v44 }
 0x2e1   : > { %1904 = vmatpush3.bf16.xpose.msra.mxu1 %v1191_v47 }
 0x2e8   : > { %1906 = vmatmul.mubr.msk.bf16.vlgmr.msra.gmra.mxu1 %vm470_vm1, %v1147_v51 }
 0x2e9   : > { %1909 = vmatprep.mubr.msk.bf16.mxu1 %vm470_vm1, %v1148_v52 }
 0x2f0   : > { %1910 = vmatmul.mubr.msk.bf16.gmra.mxu1 %vm470_vm1, %v1149_v55 }
 0x3a8   : > { %v1907_v56 = vpop.f32.mrf.mxu1 }
 0x3a9   : > { %v1274_v38 = vsel %vm1267_vm4, %v1907_v56, -inf }
 0x3aa   : > { %1275 = vmax.xlane.f32.xlu1 %v1274_v38  ;;  %v1236_v57 = vpop.f32.mrf.mxu1 }
 0x3ab   : > { %v1268_v58 = vsel %vm1267_vm4, %v1236_v57, -inf }
 0x3ac   : > { %1269 = vmax.xlane.f32.xlu0 %v1268_v58  ;;  %v1908_v59 = vpop.f32.mrf.mxu1 }
 0x3ad   : > { %v1277_v60 = vsel %vm1267_vm4, %v1908_v59, -inf }
 0x3ae   : > { %1278 = vmax.xlane.f32.xlu1 %v1277_v60  ;;  %v1239_v61 = vpop.f32.mrf.mxu1  ;;  %v1986_v60 = vld [vmem:[%s2367_s10] sm:$0xff]  }
 0x3af   : > { %v1271_v62 = vsel %vm1267_vm4, %v1239_v61, -inf }
 0x3b0   : > { %1272 = vmax.xlane.f32.xlu0 %v1271_v62  ;;  %v1911_v63 = vpop.f32.mrf.mxu1 }
 0x3b1   : > { %v1286_v4 = vsel %vm1267_vm4, %v1911_v63, -inf }
 0x3b2   : > { %v1252_v0 = vpop.f32.mrf.mxu1 }
 0x3b3   : > { %v1280_v1 = vsel %vm1267_vm4, %v1252_v0, -inf }
 0x3b4   : > { %1281 = vmax.xlane.f32.xlu0 %v1280_v1  ;;  %v1912_v2 = vpop.f32.mrf.mxu1 }
 0x3b5   : > { %v1289_v6 = vsel %vm1267_vm4, %v1912_v2, -inf }
 0x3b6   : > { %v1255_v3 = vpop.f32.mrf.mxu1 }
 0x3b7   : > { %v1283_v5 = vsel %vm1267_vm4, %v1255_v3, -inf }
 0x3b8   : > { %1287 = vmax.xlane.f32.xlu0 %v1286_v4  ;;  %1284 = vmax.xlane.f32.xlu1 %v1283_v5 }
 0x3bc   : > { %1290 = vmax.xlane.f32.xlu1 %v1289_v6 }
 0x433   : > { %v1276_v11 = vpop.xlane.xlu1 %1275 }
 0x434   : > { %v1294_v12 = vsub.f32 %v1907_v56, %v1276_v11 }
 0x435   : > { %v1270_v13 = vpop.xlane.xlu0 %1269 }
 0x436   : > { %v1292_v15 = vsub.f32 %v1236_v57, %v1270_v13  ;;  %v1304_v18 = vmul.f32 1.442695, %v1294_v12 }
 0x437   : > { %v1279_v16 = vpop.xlane.xlu1 %1278 }
 0x438   : > { %v1300_v19 = vmul.f32 1.442695, %v1292_v15  ;;  %v1295_v21 = vsub.f32 %v1908_v59, %v1279_v16  ;;  %v1985_v59 = vld [vmem:[%s2367_s10 + $0x8] sm:$0xff]  }
 0x439   : > { %v1273_v22 = vpop.xlane.xlu0 %1272  ;;  %1929 = vmatprep.subr.bf16.mxu0 %v1985_v59 }
 0x43a   : > { %1989 = vpow2.f32 %v1300_v19  ;;  %v1306_v24 = vmul.f32 1.442695, %v1295_v21  ;;  %v1293_v25 = vsub.f32 %v1239_v61, %v1273_v22 }
 0x43b   : > { %1991 = vpow2.f32 %v1304_v18 }
 0x43c   : > { %v1302_v26 = vmul.f32 1.442695, %v1293_v25  ;;  %1993 = vpow2.f32 %v1306_v24 }
 0x43d   : > { %v1282_v27 = vpop.xlane.xlu0 %1281 }
 0x43e   : > { %1995 = vpow2.f32 %v1302_v26  ;;  %v1296_v28 = vsub.f32 %v1252_v0, %v1282_v27 }
 0x440   : > { %v1308_v29 = vmul.f32 1.442695, %v1296_v28 }
 0x441   : > { %v1288_v30 = vpop.xlane.xlu0 %1287  ;;  %v1285_v31 = vpop.xlane.xlu1 %1284 }
 0x442   : > { %1997 = vpow2.f32 %v1308_v29  ;;  %v1298_v32 = vsub.f32 %v1911_v63, %v1288_v30  ;;  %v1297_v33 = vsub.f32 %v1255_v3, %v1285_v31 }
 0x444   : > { %v1312_v34 = vmul.f32 1.442695, %v1298_v32  ;;  %v1310_v35 = vmul.f32 1.442695, %v1297_v33 }
 0x445   : > { %v1291_v36 = vpop.xlane.xlu1 %1290 }
 0x446   : > { %1999 = vpow2.f32 %v1312_v34  ;;  %v1299_v37 = vsub.f32 %v1912_v2, %v1291_v36 }
 0x447   : > { %v1990_v39 = vpop.eup %1989  ;;  %2001 = vpow2.f32 %v1310_v35 }
 0x448   : > { %v1314_v41 = vmul.f32 1.442695, %v1299_v37  ;;  %v1316_v42 = vsel %vm1267_vm4, %v1990_v39, 0.0  ;;  %v1992_v43 = vpop.eup %1991 }
 0x449   : > { %1317 = vadd.xlane.f32.xlu0 %v1316_v42  ;;  %v1994_v44 = vpop.eup %1993  ;;  %v1322_v46 = vsel %vm1267_vm4, %v1992_v43, 0.0 }
 0x44a   : > { %2003 = vpow2.f32 %v1314_v41  ;;  %v1341_v40 = vpack.c.bf16 %v1994_v44, %v1992_v43  ;;  %v1325_v51 = vsel %vm1267_vm4, %v1994_v44, 0.0  ;;  %v1759_v44 = vld [vmem:[%s2368_s11] ss:$0 sm:$0xff] }
 0x44b   : > { %v1996_v45 = vpop.eup %1995 }
 0x44c   : > { %v1319_v47 = vsel %vm1267_vm4, %v1996_v45, 0.0  ;;  %v1340_v48 = vpack.c.bf16 %v1996_v45, %v1990_v39 }
 0x44d   : > { %1323 = vadd.xlane.f32.xlu0 %v1322_v46  ;;  %1320 = vadd.xlane.f32.xlu1 %v1319_v47 }
 0x44e   : > { %1921 = vmatprep.mubr.msk.bf16.mxu0 %vm1267_vm4, %v1340_v48 }
 0x44f   : > { %v1998_v49 = vpop.eup %1997  ;;  %1922 = vmatmul.mubr.msk.bf16.vlgmr.msra.gmra.mxu0 %vm1267_vm4, %v1341_v40 }
 0x450   : > { %v1328_v50 = vsel %vm1267_vm4, %v1998_v49, 0.0  ;;  %1930 = vmatpush3.bf16.msra.mxu0 %v1985_v59 }
 0x451   : > { %1329 = vadd.xlane.f32.xlu0 %v1328_v50  ;;  %1326 = vadd.xlane.f32.xlu1 %v1325_v51 }
 0x452   : > { %1931 = vmatprep.subr.bf16.mxu0 %v1986_v60 }
 0x453   : > { %v2000_v52 = vpop.eup %1999 }
 0x454   : > { %v2002_v53 = vpop.eup %2001  ;;  %v1334_v54 = vsel %vm1267_vm4, %v2000_v52, 0.0  ;;  %1932 = vmatpush3.bf16.msra.mxu0 %v1986_v60 }
 0x455   : > { %1335 = vadd.xlane.f32.xlu0 %v1334_v54  ;;  %v1331_v55 = vsel %vm1267_vm4, %v2002_v53, 0.0  ;;  %v1342_v56 = vpack.c.bf16 %v2002_v53, %v1998_v49 }
 0x456   : > { %1332 = vadd.xlane.f32.xlu1 %v1331_v55 }
 0x457   : > { %v2004_v38 = vpop.eup %2003  ;;  %1925 = vmatprep.mubr.msk.bf16.mxu0 %vm1267_vm4, %v1342_v56 }
 0x458   : > { %v1337_v57 = vsel %vm1267_vm4, %v2004_v38, 0.0  ;;  %v1343_v58 = vpack.c.bf16 %v2004_v38, %v2000_v52 }
 0x45a   : > { %1338 = vadd.xlane.f32.xlu1 %v1337_v57  ;;  %1926 = vmatmul.mubr.msk.bf16.gmra.mxu0 %vm1267_vm4, %v1343_v58 }
 0x4d2   : > { %v1318_v62 = vpop.xlane.xlu0 %1317 }
 0x4d3   : > { %2005 = vrcp.f32 %v1318_v62 }
 0x4d6   : > { %v1321_v61 = vpop.xlane.xlu1 %1320  ;;  %v1324_v0 = vpop.xlane.xlu0 %1323 }
 0x4da   : > { %v1327_v63 = vpop.xlane.xlu1 %1326  ;;  %v1330_v2 = vpop.xlane.xlu0 %1329 }
 0x4db   : > { %2007 = vrcp.f32 %v1327_v63 }
 0x4dc   : > { %2009 = vrcp.f32 %v1321_v61 }
 0x4dd   : > { %2011 = vrcp.f32 %v1324_v0 }
 0x4de   : > { %2013 = vrcp.f32 %v1330_v2  ;;  %v1336_v5 = vpop.xlane.xlu0 %1335 }
 0x4df   : > { %v1333_v1 = vpop.xlane.xlu1 %1332 }
 0x4e0   : > { %v2006_v11 = vpop.eup %2005 }
 0x4e3   : > { %v1339_v3 = vpop.xlane.xlu1 %1338 }
 0x4e4   : > { %2015 = vrcp.f32 %v1339_v3 }
 0x4e5   : > { %2017 = vrcp.f32 %v1333_v1 }
 0x4e6   : > { %2019 = vrcp.f32 %v1336_v5 }
 0x4e8   : > { %v2008_v13 = vpop.eup %2007 }
 0x4e9   : > { %v2010_v15 = vpop.eup %2009 }
 0x4ea   : > { %v2012_v19 = vpop.eup %2011 }
 0x4eb   : > { %v2014_v29 = vpop.eup %2013 }
 0x4f1   : > { %v2016_v31 = vpop.eup %2015 }
 0x4f2   : > { %v2018_v32 = vpop.eup %2017 }
 0x4f3   : > { %v2020_v35 = vpop.eup %2019 }
 0x50f   : > { %v1923_v4 = vpop.f32.mrf.mxu0 }
 0x510   : > { %v1463_v24 = vmul.f32 %v2012_v19, %v1923_v4 }
 0x511   : > { %v1422_v6 = vpop.f32.mrf.mxu0 }
 0x512   : > { %v1461_v21 = vmul.f32 %v2006_v11, %v1422_v6 }
 0x513   : > { %v1924_v12 = vpop.f32.mrf.mxu0 }
 0x514   : > { %v1464_v16 = vmul.f32 %v2008_v13, %v1924_v12 }
 0x515   : > { %v1425_v18 = vpop.f32.mrf.mxu0 }
 0x516   : > { %v1462_v22 = vmul.f32 %v2010_v15, %v1425_v18  ;;  %v1470_v26 = vpack.c.bf16 %v1464_v16, %v1463_v24 }
 0x518   : > { %v1469_v25 = vpack.c.bf16 %v1462_v22, %v1461_v21 }
 0x51a   : > { %v1927_v27 = vpop.f32.mrf.mxu0  ;;  %1933 = vmatprep.mubr.msk.bf16.mxu0 %vm470_vm1, %v1469_v25 }
 0x51b   : > { %1934 = vmatmul.mubr.msk.bf16.vlgmr.msra.gmra.mxu0 %vm470_vm1, %v1470_v26  ;;  %v1467_v39 = vmul.f32 %v2020_v35, %v1927_v27 }
 0x51c   : > { %v1438_v28 = vpop.f32.mrf.mxu0 }
 0x51d   : > { %v1465_v36 = vmul.f32 %v2014_v29, %v1438_v28 }
 0x51e   : > { %v1928_v30 = vpop.f32.mrf.mxu0 }
 0x51f   : > { %v1468_v33 = vmul.f32 %v2016_v31, %v1928_v30 }
 0x520   : > { %v1441_v34 = vpop.f32.mrf.mxu0 }
 0x521   : > { %v1466_v37 = vmul.f32 %v2018_v32, %v1441_v34  ;;  %v1472_v42 = vpack.c.bf16 %v1468_v33, %v1467_v39 }
 0x523   : > { %v1471_v41 = vpack.c.bf16 %v1466_v37, %v1465_v36 }
 0x525   : > { %1937 = vmatprep.mubr.msk.bf16.mxu0 %vm470_vm1, %v1471_v41 }
 0x526   : > { %1938 = vmatmul.mubr.msk.bf16.gmra.mxu0 %vm470_vm1, %v1472_v42 }
 0x5db   : > { %v1935_v43 = vpop.f32.mrf.mxu0 }
 0x5dc   : > { %v1568_v45 = vadd.f32 %v1935_v43, %v2149_v9 }
 0x5dd   : > { %v1535_v46 = vpop.f32.mrf.mxu0 }
 0x5de   : > { %v1583_v47 = vadd.f32 %v1759_v44, %v1568_v45  ;;  %v1566_v48 = vadd.f32 %v1535_v46, %v2145_v7 }
 0x5df   : > { %v1936_v40 = vpop.f32.mrf.mxu0 }
 0x5e0   : > { %1591 = vst.msk [vmem:[%s446_s19 + $0x10] sm:$0xff] %vm470_vm1, %v1583_v47  ;;  %v1581_v49 = vadd.f32 %v1759_v44, %v1566_v48  ;;  %v1569_v50 = vadd.f32 %v1936_v40, %v2151_v10 }
 0x5e1   : > { %v1538_v51 = vpop.f32.mrf.mxu0 }
 0x5e2   : > { %1589 = vst.msk [vmem:[%s446_s19] sm:$0xff] %vm470_vm1, %v1581_v49  ;;  %v1584_v52 = vadd.f32 %v1759_v44, %v1569_v50  ;;  %v1567_v9 = vadd.f32 %v1538_v51, %v2147_v8 }
 0x5e4   : > { %1592 = vst.msk [vmem:[%s446_s19 + $0x18] sm:$0xff] %vm470_vm1, %v1584_v52  ;;  %v1582_v53 = vadd.f32 %v1759_v44, %v1567_v9 }
 0x5e6   : > { %1590 = vst.msk [vmem:[%s446_s19 + $0x8] sm:$0xff] %vm470_vm1, %v1582_v53  ;;  %v1939_v54 = vpop.f32.mrf.mxu0 }
 0x5e7   : > { %v1572_v7 = vadd.f32 %v1939_v54, %v2167_v20 }
 0x5e8   : > { %v1551_v55 = vpop.f32.mrf.mxu0 }
 0x5e9   : > { %v1587_v56 = vadd.f32 %v1759_v44, %v1572_v7  ;;  %v1570_v38 = vadd.f32 %v1551_v55, %v2159_v14 }
 0x5ea   : > { %v1940_v57 = vpop.f32.mrf.mxu0 }
 0x5eb   : > { %1595 = vst.msk [vmem:[%s446_s19 + $0x30] sm:$0xff] %vm470_vm1, %v1587_v56  ;;  %v1585_v10 = vadd.f32 %v1759_v44, %v1570_v38  ;;  %v1573_v58 = vadd.f32 %v1940_v57, %v2171_v23 }
 0x5ec   : > { %v1554_v59 = vpop.f32.mrf.mxu0 }
 0x5ed   : > { %1593 = vst.msk [vmem:[%s446_s19 + $0x20] sm:$0xff] %vm470_vm1, %v1585_v10  ;;  %v1588_v8 = vadd.f32 %v1759_v44, %v1573_v58  ;;  %v1571_v60 = vadd.f32 %v1554_v59, %v2163_v17 }
 0x5ef   : > { %1596 = vst.msk [vmem:[%s446_s19 + $0x38] sm:$0xff] %vm470_vm1, %v1588_v8  ;;  %v1586_v61 = vadd.f32 %v1759_v44, %v1571_v60 }
 0x5f1   : > { %1594 = vst.msk [vmem:[%s446_s19 + $0x28] sm:$0xff] %vm470_vm1, %v1586_v61 }
 0x5f2 PF: > { %s22_s23 = sadd.s32 1, %s2043_s23   ;;  %s2370_s21 = smov %s2039_s22 }
 0x5f3   : > { %p19_p5 = scmp.ge.s32.totalorder %s22_s23, 4   ;;  %s2371_s22 = smov %s2373_s24 }
 0x5f5   :  { %21 = sbr.rel (!%p19_p5) target bundleno = 2 (0x2), region = 103 }

// kernel: tpu_custom_call.1
= control target key start
LH: loop header
LB: loop body
LE: loop exit
PB: predicated region body
PF: predicated region fallthrough
CT: control target
= control target key end

     0   :  { %s2112_s21 = smov 0   ;;  %s2114_s22 = smov 0   ;;  %s2357_s0 = inlined_call_operand.vmem [shape: f32[2,64,32], index: 0, kind: input, shape index: {}]   ;;  %s2358_s1 = inlined_call_operand.vmem [shape: f32[1,32], index: 1, kind: input, shape index: {}]   ;;  %s2359_s2 = inlined_call_operand.vmem [shape: f32[1,32], index: 2, kind: input, shape index: {}]   ;;  %s2360_s3 = inlined_call_operand.vmem [shape: bf16[32,32], index: 3, kind: input, shape index: {}]   ;;  %s2361_s4 = inlined_call_operand.vmem [shape: bf16[32,32], index: 4, kind: input, shape index: {}]   ;;  %s2362_s5 = inlined_call_operand.vmem [shape: f32[1,32], index: 5, kind: input, shape index: {}]   ;;  %s2363_s6 = inlined_call_operand.vmem [shape: bf16[32,32], index: 6, kind: input, shape index: {}]   ;;  %s2364_s7 = inlined_call_operand.vmem [shape: f32[1,32], index: 7, kind: input, shape index: {}]   ;;  %s2365_s8 = inlined_call_operand.vmem [shape: bf16[32,32], index: 8, kind: input, shape index: {}]   ;;  %s2366_s9 = inlined_call_operand.vmem [shape: f32[1,32], index: 9, kind: input, shape index: {}]   ;;  %s2367_s10 = inlined_call_operand.vmem [shape: bf16[32,32], index: 10, kind: input, shape index: {}]   ;;  %s2368_s11 = inlined_call_operand.vmem [shape: f32[1,32], index: 11, kind: input, shape index: {}]   ;;  %s2369_s12 = inlined_call_operand.vmem [shape: f32[2,64,32], index: 12, kind: output, shape index: {}]  }
   0x1   :  { %s2116_s23 = smov 0  }
   0x2 LB: > { %s41_s24 = sadd.s32 1, %s2039_s22  ;;  %p1691_p0 = scmp.ge.s32.totalorder %s2043_s23, 1  ;;  %s2043_s23 = sphi %s2116_s23, %s22_s23   ;;  %s2039_s22 = sphi %s2114_s22, %s2371_s22   ;;  %s2035_s21 = sphi %s2112_s21, %s2370_s21  }
   0x3   : > { %p43_p1 = scmp.ge.s32.totalorder %s41_s24, 2  ;;  %p385_p2 = scmp.lt.s32.totalorder %s2043_s23, 3 }
   0x5   : > { %s2373_s24 = smov (%p43_p1, %s41_s24), 0  ;;  %p386_p3 = pnand %p1691_p0, %p385_p2 }
   0x6   : > { %p432_p4 = scmp.lt.s32.totalorder (!%p386_p3), %s2035_s21, 1 }
   0x7   : > { %389 = sbr.rel (%p386_p3) target bundleno = 1522 (0x5f2), region = 68 }
   0xc   : > { %v1788_v0 = vld [vmem:[%s2360_s3 + $0x8] sm:$0xff]   ;;  %v1781_v1 = vld [vmem:[%s2360_s3] sm:$0xff]   ;;  %v2045_v2 = vmov 0.0   ;;  %vm2046_vm0 = vmmov 0   ;;  %s2375_s21 = smov (!%p432_p4, %s2035_s21), 1  ;;  %vm470_vm1 = vcmask 261120   ;;  %v567_v36 = vlaneseq }
   0xd   : > { %1839 = vmatprep.subr.mxu1 %v2045_v2  ;;  %v1786_v3 = vunpack.c.l.bf16 %v1788_v0  ;;  %v1787_v4 = vunpack.c.h.bf16 %v1788_v0  ;;  %1847 = vmatprep.mubr.msk.f32.mxu1 %vm2046_vm0, %v2045_v2  ;;  %v1783_v5 = vunpack.c.h.bf16 %v1781_v1  ;;  %s1762_s29 = sshll.u32 %s2375_s21, 6  ;;  %v1782_v6 = vunpack.c.l.bf16 %v1781_v1 }
   0xe   : > { %s436_s14 = scalar_lea.vmem %s2357_s0, %s1762_s29  ;;  %v568_v37 = vshrl.u32 %v567_v36, 7  ;;  %vm690_vm2 = vcmask 253952   ;;  %v687_v36 = vld [vmem:[%s2359_s2] sm:$0x1]  ;;  %vm863_vm3 = vcmask 257024   ;;  %vm1267_vm4 = vcmask 523264   ;;  %s446_s19 = scalar_lea.vmem %s2369_s12, %s1762_s29 }
   0xf   : > { %1840 = vmatpush3.msra.mxu1 %v1787_v4  ;;  %v2145_v7 = vld [vmem:[%s436_s14] sm:$0xff]  ;;  %v2147_v8 = vld [vmem:[%s436_s14 + $0x8] sm:$0xff]  ;;  %v2149_v9 = vld [vmem:[%s436_s14 + $0x10] sm:$0xff] }
  0x10   : > { %1841 = vmatprep.subr.mxu1 %v2045_v2  ;;  %v2151_v10 = vld [vmem:[%s436_s14 + $0x18] sm:$0xff]  ;;  %v471_v11 = vsel %vm470_vm1, %v2145_v7, 0.0  ;;  %v472_v12 = vsel %vm470_vm1, %v2147_v8, 0.0  ;;  %v474_v13 = vsel %vm470_vm1, %v2149_v9, 0.0  ;;  %v2159_v14 = vld [vmem:[%s436_s14 + $0x20] sm:$0xff]  ;;  %v2163_v17 = vld [vmem:[%s436_s14 + $0x28] sm:$0xff] }
  0x11   : > { %1842 = vmatpush3.msra.mxu1 %v1786_v3  ;;  %v473_v15 = vadd.f32 %v472_v12, %v471_v11  ;;  %v476_v16 = vsel %vm470_vm1, %v2151_v10, 0.0  ;;  %v478_v19 = vsel %vm470_vm1, %v2159_v14, 0.0  ;;  %v2167_v20 = vld [vmem:[%s436_s14 + $0x30] sm:$0xff]  ;;  %v480_v22 = vsel %vm470_vm1, %v2163_v17, 0.0  ;;  %v2171_v23 = vld [vmem:[%s436_s14 + $0x38] sm:$0xff] }
  0x12   : > { %1843 = vmatprep.subr.mxu1 %v2045_v2  ;;  %v482_v25 = vsel %vm470_vm1, %v2167_v20, 0.0  ;;  %v484_v27 = vsel %vm470_vm1, %v2171_v23, 0.0  ;;  %v2179_v38 = vsub.s32 0, %v568_v37 }
  0x13   : > { %1844 = vmatpush3.msra.mxu1 %v1783_v5  ;;  %v475_v18 = vadd.f32 %v474_v13, %v473_v15 }
  0x14   : > { %1845 = vmatprep.subr.mxu1 %v2045_v2 }
  0x15   : > { %1846 = vmatpush3.msra.mxu1 %v1782_v6  ;;  %v477_v21 = vadd.f32 %v476_v16, %v475_v18 }
  0x16   : > { %1850 = vmatprep.subr.mxu1 %v2045_v2 }
  0x17   : > { %v479_v24 = vadd.f32 %v478_v19, %v477_v21 }
  0x19   : > { %v481_v26 = vadd.f32 %v480_v22, %v479_v24  ;;  %v1971_v24 = vld [vmem:[%s2363_s6 + $0x8] sm:$0xff]  }
  0x1a   : > { %1861 = vmatprep.subr.bf16.mxu0 %v1971_v24 }
  0x1b   : > { %v483_v28 = vadd.f32 %v482_v25, %v481_v26  ;;  %v1972_v25 = vld [vmem:[%s2365_s8 + $0x8] sm:$0xff]   ;;  %v1973_v26 = vld [vmem:[%s2363_s6] sm:$0xff]   ;;  %1862 = vmatpush3.bf16.msra.mxu0 %v1971_v24 }
  0x1c   : > { %1863 = vmatprep.subr.bf16.mxu0 %v1973_v26 }
  0x1d   : > { %v485_v29 = vadd.f32 %v484_v27, %v483_v28  ;;  %v1974_v27 = vld [vmem:[%s2365_s8] sm:$0xff]   ;;  %v1975_v28 = vld [vmem:[%s2361_s4 + $0x8] sm:$0xff]  }
  0x1f   : > { %v486_v30 = vrot.slane %v485_v29, 4  ;;  %1864 = vmatpush3.bf16.msra.mxu0 %v1973_v26 }
  0x20   : > { %1885 = vmatprep.subr.bf16.mxu0 %v1975_v28 }
  0x21   : > { %v487_v31 = vadd.f32 %v486_v30, %v485_v29 }
  0x23   : > { %v488_v32 = vrot.slane %v487_v31, 2 }
  0x25   : > { %v489_v33 = vadd.f32 %v488_v32, %v487_v31 }
  0x27   : > { %v490_v34 = vrot.slane %v489_v33, 1 }
  0x29   : > { %v491_v35 = vadd.f32 %v490_v34, %v489_v33  ;;  %v685_v33 = vld [vmem:[%s2358_s1] sm:$0x1] }
  0x2b   : > { %1848 = vmatmul.mubr.msk.f32.vlgmr.msra.gmra.mxu1 %vm470_vm1, %v491_v35 }
  0x2c   : > { %1851 = vmatpush3.msra.mxu1 %v1787_v4  ;;  %1858 = vmatprep.mubr.msk.f32.mxu1 %vm2046_vm0, %v2045_v2 }
  0x2d   : > { %1852 = vmatprep.subr.mxu1 %v2045_v2 }
  0x2e   : > { %1853 = vmatpush3.msra.mxu1 %v1786_v3 }
  0x2f   : > { %1854 = vmatprep.subr.mxu1 %v2045_v2 }
  0x30   : > { %1855 = vmatpush3.msra.mxu1 %v1783_v5 }
  0x31   : > { %1856 = vmatprep.subr.mxu1 %v2045_v2 }
  0x32   : > { %1857 = vmatpush3.msra.mxu1 %v1782_v6 }
  0x33   : > { %1873 = vmatprep.subr.bf16.mxu1 %v1972_v25 }
  0xeb   : > { %v562_v39 = vpop.f32.mrf.mxu1 }
  0xec   : > { %v2181_v40 = vmul.f32 0.015625, %v562_v39 }
  0xed   : > { %v1849_v41 = vpop.f32.mrf.mxu1 }
  0xee   : > { %v570_v42 = vrot.slane %v2181_v40, %v2179_v38 }
  0xf0   : > { %v571_v43 = vsub.f32 %v2145_v7, %v570_v42  ;;  %v572_v44 = vsub.f32 %v2147_v8, %v570_v42  ;;  %v573_v45 = vsub.f32 %v2149_v9, %v570_v42  ;;  %v574_v46 = vsub.f32 %v2151_v10, %v570_v42 }
  0xf1   : > { %v575_v47 = vsub.f32 %v2159_v14, %v570_v42  ;;  %v576_v51 = vsub.f32 %v2163_v17, %v570_v42  ;;  %v577_v56 = vsub.f32 %v2167_v20, %v570_v42  ;;  %v578_v60 = vsub.f32 %v2171_v23, %v570_v42 }
  0xf2   : > { %v579_v48 = vmul.f32 %v571_v43, %v571_v43  ;;  %v580_v49 = vmul.f32 %v572_v44, %v572_v44  ;;  %v581_v50 = vmul.f32 %v573_v45, %v573_v45  ;;  %v582_v52 = vmul.f32 %v574_v46, %v574_v46 }
  0xf3   : > { %v583_v57 = vmul.f32 %v575_v47, %v575_v47  ;;  %v584_v61 = vmul.f32 %v576_v51, %v576_v51  ;;  %v585_v0 = vmul.f32 %v577_v56, %v577_v56  ;;  %v586_v3 = vmul.f32 %v578_v60, %v578_v60 }
  0xf4   : > { %v587_v53 = vsel %vm470_vm1, %v579_v48, 0.0  ;;  %v588_v54 = vsel %vm470_vm1, %v580_v49, 0.0  ;;  %v590_v58 = vsel %vm470_vm1, %v581_v50, 0.0  ;;  %v592_v62 = vsel %vm470_vm1, %v582_v52, 0.0 }
  0xf5   : > { %v589_v55 = vadd.f32 %v588_v54, %v587_v53  ;;  %v594_v1 = vsel %vm470_vm1, %v583_v57, 0.0  ;;  %v596_v4 = vsel %vm470_vm1, %v584_v61, 0.0  ;;  %v598_v6 = vsel %vm470_vm1, %v585_v0, 0.0  ;;  %v1976_v57 = vld [vmem:[%s2361_s4] sm:$0xff]  }
  0xf6   : > { %v600_v12 = vsel %vm470_vm1, %v586_v3, 0.0 }
  0xf7   : > { %v591_v59 = vadd.f32 %v590_v58, %v589_v55 }
  0xf9   : > { %v593_v63 = vadd.f32 %v592_v62, %v591_v59 }
  0xfb   : > { %v595_v2 = vadd.f32 %v594_v1, %v593_v63 }
  0xfd   : > { %v597_v5 = vadd.f32 %v596_v4, %v595_v2 }
  0xff   : > { %v599_v11 = vadd.f32 %v598_v6, %v597_v5 }
 0x101   : > { %v601_v13 = vadd.f32 %v600_v12, %v599_v11 }
 0x103   : > { %v602_v15 = vrot.slane %v601_v13, 4 }
 0x105   : > { %v603_v16 = vadd.f32 %v602_v15, %v601_v13 }
 0x107   : > { %v604_v18 = vrot.slane %v603_v16, 2 }
 0x109   : > { %v605_v19 = vadd.f32 %v604_v18, %v603_v16 }
 0x10b   : > { %v606_v21 = vrot.slane %v605_v19, 1 }
 0x10d   : > { %v607_v22 = vadd.f32 %v606_v21, %v605_v19 }
 0x10f   : > { %1859 = vmatmul.mubr.msk.f32.vlgmr.msra.gmra.mxu1 %vm470_vm1, %v607_v22 }
 0x110   : > { %1874 = vmatpush3.bf16.msra.mxu1 %v1972_v25 }
 0x111   : > { %1875 = vmatprep.subr.bf16.mxu1 %v1974_v27 }
 0x114   : > { %1876 = vmatpush3.bf16.msra.mxu1 %v1974_v27 }
 0x1cf   : > { %v678_v29 = vpop.f32.mrf.mxu1 }
 0x1d0   : > { %v682_v30 = vmul.f32 0.015625, %v678_v29  ;;  %v1713_v29 = vld [vmem:[%s2366_s9] ss:$0 sm:$0xff] }
 0x1d1   : > { %v1860_v31 = vpop.f32.mrf.mxu1 }
 0x1d2   : > { %v683_v32 = vadd.f32 1e-05, %v682_v30 }
 0x1d4   : > { %1987 = vrsqrt.f32 %v683_v32 }
 0x1e1   : > { %v1988_v34 = vpop.eup %1987 }
 0x1e2   : > { %v686_v35 = vmul.f32 %v1988_v34, %v685_v33 }
 0x1e4   : > { %v688_v37 = vmul.f32 %v686_v35, %v2181_v40  ;;  %691 = vst.msk [vmem:[#allocation4] sm:$0x1] %vm690_vm2, %v686_v35  ;;  %v704_v39 = vrot.slane %v686_v35, %v2179_v38 }
 0x1e6   : > { %v689_v41 = vsub.f32 %v687_v36, %v688_v37  ;;  %v705_v42 = vmul.f32 %v704_v39, %v2145_v7  ;;  %v706_v44 = vmul.f32 %v704_v39, %v2147_v8  ;;  %v707_v45 = vmul.f32 %v704_v39, %v2149_v9 }
 0x1e7   : > { %v708_v46 = vmul.f32 %v704_v39, %v2151_v10  ;;  %v709_v47 = vmul.f32 %v704_v39, %v2159_v14  ;;  %v710_v48 = vmul.f32 %v704_v39, %v2163_v17  ;;  %v711_v58 = vmul.f32 %v704_v39, %v2167_v20 }
 0x1e8   : > { %692 = vst.msk [vmem:[#allocation5] sm:$0x1] %vm690_vm2, %v689_v41  ;;  %v717_v43 = vrot.slane %v689_v41, %v2179_v38  ;;  %v712_v59 = vmul.f32 %v704_v39, %v2171_v23 }
 0x1ea   : > { %v719_v40 = vadd.f32 %v717_v43, %v705_v42  ;;  %v720_v49 = vadd.f32 %v717_v43, %v706_v44  ;;  %v721_v50 = vadd.f32 %v717_v43, %v707_v45  ;;  %v722_v51 = vadd.f32 %v717_v43, %v708_v46 }
 0x1eb   : > { %v723_v52 = vadd.f32 %v717_v43, %v709_v47  ;;  %v724_v53 = vadd.f32 %v717_v43, %v710_v48  ;;  %v1728_v56 = vld [vmem:[#allocation4] ss:$0 sm:$0xff]  ;;  %v725_v63 = vadd.f32 %v717_v43, %v711_v58  ;;  %v726_v0 = vadd.f32 %v717_v43, %v712_v59 }
 0x1ec   : > { %v727_v54 = vpack.c.bf16 %v720_v49, %v719_v40  ;;  %v728_v55 = vpack.c.bf16 %v722_v51, %v721_v50  ;;  %v1018_v61 = vmul.f32 %v1728_v56, %v2145_v7  ;;  %v1019_v62 = vmul.f32 %v1728_v56, %v2147_v8 }
 0x1ed   : > { %v729_v38 = vpack.c.bf16 %v724_v53, %v723_v52  ;;  %v730_v3 = vpack.c.bf16 %v726_v0, %v725_v63  ;;  %v1020_v5 = vmul.f32 %v1728_v56, %v2149_v9  ;;  %v1021_v6 = vmul.f32 %v1728_v56, %v2151_v10 }
 0x1ee   : > { %1865 = vmatprep.mubr.msk.bf16.mxu0 %vm470_vm1, %v727_v54  ;;  %1877 = vmatprep.mubr.msk.bf16.mxu1 %vm470_vm1, %v727_v54  ;;  %v1022_v11 = vmul.f32 %v1728_v56, %v2159_v14  ;;  %v1023_v12 = vmul.f32 %v1728_v56, %v2163_v17  ;;  %v1024_v22 = vmul.f32 %v1728_v56, %v2167_v20 }
 0x1ef   : > { %1866 = vmatmul.mubr.msk.bf16.vlgmr.msra.gmra.mxu0 %vm470_vm1, %v728_v55  ;;  %1878 = vmatmul.mubr.msk.bf16.vlgmr.msra.gmra.mxu1 %vm470_vm1, %v728_v55  ;;  %v1729_v60 = vld [vmem:[#allocation5] ss:$0 sm:$0xff]  ;;  %v1025_v24 = vmul.f32 %v1728_v56, %v2171_v23 }
 0x1f0   : > { %1869 = vmatprep.mubr.msk.bf16.mxu0 %vm470_vm1, %v729_v38  ;;  %1881 = vmatprep.mubr.msk.bf16.mxu1 %vm470_vm1, %v729_v38  ;;  %v1033_v1 = vadd.f32 %v1729_v60, %v1018_v61  ;;  %v1034_v2 = vadd.f32 %v1729_v60, %v1019_v62  ;;  %v1035_v13 = vadd.f32 %v1729_v60, %v1020_v5 }
 0x1f1   : > { %1886 = vmatpush3.bf16.msra.mxu0 %v1975_v28  ;;  %v1036_v15 = vadd.f32 %v1729_v60, %v1021_v6  ;;  %v1037_v16 = vadd.f32 %v1729_v60, %v1022_v11  ;;  %v1038_v18 = vadd.f32 %v1729_v60, %v1023_v12  ;;  %v1039_v25 = vadd.f32 %v1729_v60, %v1024_v22  ;;  %v1698_v28 = vld [vmem:[%s2364_s7] ss:$0 sm:$0xff] }
 0x1f2   : > { %1887 = vmatprep.subr.bf16.mxu0 %v1976_v57  ;;  %v1041_v4 = vpack.c.bf16 %v1034_v2, %v1033_v1  ;;  %v1040_v26 = vadd.f32 %v1729_v60, %v1025_v24 }
 0x1f3   : > { %v1042_v19 = vpack.c.bf16 %v1036_v15, %v1035_v13  ;;  %v1043_v21 = vpack.c.bf16 %v1038_v18, %v1037_v16 }
 0x1f4   : > { %v1044_v27 = vpack.c.bf16 %v1040_v26, %v1039_v25  ;;  %v1730_v25 = vld [vmem:[%s2362_s5] ss:$0 sm:$0xff] }
 0x1f5   : > { %1888 = vmatpush3.bf16.msra.mxu0 %v1976_v57 }
 0x1f7   : > { %1870 = vmatmul.mubr.msk.bf16.gmra.mxu0 %vm470_vm1, %v730_v3  ;;  %1882 = vmatmul.mubr.msk.bf16.gmra.mxu1 %vm470_vm1, %v730_v3 }
 0x1f8   : > { %1889 = vmatprep.mubr.msk.bf16.mxu0 %vm470_vm1, %v1041_v4 }
 0x1ff   : > { %1890 = vmatmul.mubr.msk.bf16.vlgmr.msra.gmra.mxu0 %vm470_vm1, %v1042_v19 }
 0x200   : > { %1893 = vmatprep.mubr.msk.bf16.mxu0 %vm470_vm1, %v1043_v21 }
 0x207   : > { %1894 = vmatmul.mubr.msk.bf16.gmra.mxu0 %vm470_vm1, %v1044_v27 }
 0x2af   : > { %v1867_v30 = vpop.f32.mrf.mxu0  ;;  %v1879_v31 = vpop.f32.mrf.mxu1 }
 0x2b0   : > { %v809_v32 = vadd.f32 %v1867_v30, %v1698_v28  ;;  %v938_v33 = vadd.f32 %v1879_v31, %v1713_v29 }
 0x2b1   : > { %v800_v34 = vpop.f32.mrf.mxu0  ;;  %v929_v35 = vpop.f32.mrf.mxu1 }
 0x2b2   : > { %v1766_v36 = vpack.c.bf16 %v809_v32, %v809_v32  ;;  %v1774_v37 = vpack.c.bf16 %v938_v33, %v938_v33  ;;  %v801_v39 = vadd.f32 %v1698_v28, %v800_v34  ;;  %v930_v41 = vadd.f32 %v1713_v29, %v929_v35 }
 0x2b3   : > { %v1868_v42 = vpop.f32.mrf.mxu0  ;;  %v1880_v43 = vpop.f32.mrf.mxu1 }
 0x2b4   : > { %866 = vst.msk [vmem:[#allocation2 + $0x8] sm:$0xf] %vm863_vm3, %v1766_v36  ;;  %994 = vst.msk [vmem:[#allocation3 + $0x8] sm:$0xf] %vm863_vm3, %v1774_v37  ;;  %v1764_v44 = vpack.c.bf16 %v801_v39, %v801_v39  ;;  %v1772_v45 = vpack.c.bf16 %v930_v41, %v930_v41  ;;  %v812_v46 = vadd.f32 %v1868_v42, %v1698_v28 }
 0x2b5   : > { %v941_v47 = vadd.f32 %v1880_v43, %v1713_v29  ;;  %v803_v48 = vpop.f32.mrf.mxu0  ;;  %v932_v40 = vpop.f32.mrf.mxu1 }
 0x2b6   : > { %864 = vst.msk [vmem:[#allocation2] sm:$0xf] %vm863_vm3, %v1764_v44  ;;  %992 = vst.msk [vmem:[#allocation3] sm:$0xf] %vm863_vm3, %v1772_v45  ;;  %v1767_v49 = vpack.c.bf16 %v812_v46, %v812_v46  ;;  %v804_v51 = vadd.f32 %v1698_v28, %v803_v48  ;;  %v933_v52 = vadd.f32 %v1713_v29, %v932_v40 }
 0x2b7   : > { %v1775_v50 = vpack.c.bf16 %v941_v47, %v941_v47  ;;  %v1871_v53 = vpop.f32.mrf.mxu0  ;;  %v1883_v54 = vpop.f32.mrf.mxu1 }
 0x2b8   : > { %867 = vst.msk [vmem:[#allocation2 + $0xc] sm:$0xf] %vm863_vm3, %v1767_v49  ;;  %v1765_v55 = vpack.c.bf16 %v804_v51, %v804_v51  ;;  %v1773_v56 = vpack.c.bf16 %v933_v52, %v933_v52  ;;  %v825_v38 = vadd.f32 %v1871_v53, %v1698_v28  ;;  %v954_v57 = vadd.f32 %v1883_v54, %v1713_v29 }
 0x2b9   : > { %995 = vst.msk [vmem:[#allocation3 + $0xc] sm:$0xf] %vm863_vm3, %v1775_v50  ;;  %v816_v58 = vpop.f32.mrf.mxu0  ;;  %v945_v59 = vpop.f32.mrf.mxu1 }
 0x2ba   : > { %865 = vst.msk [vmem:[#allocation2 + $0x4] sm:$0xf] %vm863_vm3, %v1765_v55  ;;  %993 = vst.msk [vmem:[#allocation3 + $0x4] sm:$0xf] %vm863_vm3, %v1773_v56  ;;  %v1770_v60 = vpack.c.bf16 %v825_v38, %v825_v38  ;;  %v1778_v61 = vpack.c.bf16 %v954_v57, %v954_v57  ;;  %v817_v62 = vadd.f32 %v1698_v28, %v816_v58 }
 0x2bb   : > { %v946_v63 = vadd.f32 %v1713_v29, %v945_v59  ;;  %v1872_v0 = vpop.f32.mrf.mxu0  ;;  %v1884_v1 = vpop.f32.mrf.mxu1 }
 0x2bc   : > { %870 = vst.msk [vmem:[#allocation2 + $0x18] sm:$0xf] %vm863_vm3, %v1770_v60  ;;  %998 = vst.msk [vmem:[#allocation3 + $0x18] sm:$0xf] %vm863_vm3, %v1778_v61  ;;  %v1768_v2 = vpack.c.bf16 %v817_v62, %v817_v62  ;;  %v828_v4 = vadd.f32 %v1872_v0, %v1698_v28  ;;  %v957_v5 = vadd.f32 %v1884_v1, %v1713_v29 }
 0x2bd   : > { %v1776_v3 = vpack.c.bf16 %v946_v63, %v946_v63  ;;  %v819_v6 = vpop.f32.mrf.mxu0  ;;  %v948_v11 = vpop.f32.mrf.mxu1 }
 0x2be   : > { %868 = vst.msk [vmem:[#allocation2 + $0x10] sm:$0xf] %vm863_vm3, %v1768_v2  ;;  %v1771_v12 = vpack.c.bf16 %v828_v4, %v828_v4  ;;  %v1779_v13 = vpack.c.bf16 %v957_v5, %v957_v5  ;;  %v820_v15 = vadd.f32 %v1698_v28, %v819_v6  ;;  %v949_v16 = vadd.f32 %v1713_v29, %v948_v11 }
 0x2bf   : > { %996 = vst.msk [vmem:[#allocation3 + $0x10] sm:$0xf] %vm863_vm3, %v1776_v3  ;;  %v1891_v18 = vpop.f32.mrf.mxu0  ;;  %v1982_v37 = vld [vmem:[#allocation2 + $0x8] sm:$0xff]  }
 0x2c0   : > { %871 = vst.msk [vmem:[#allocation2 + $0x1c] sm:$0xf] %vm863_vm3, %v1771_v12  ;;  %999 = vst.msk [vmem:[#allocation3 + $0x1c] sm:$0xf] %vm863_vm3, %v1779_v13  ;;  %v1769_v19 = vpack.c.bf16 %v820_v15, %v820_v15  ;;  %v1777_v21 = vpack.c.bf16 %v949_v16, %v949_v16  ;;  %v1981_v35 = vld [vmem:[#allocation3 + $0x8] sm:$0xff]   ;;  %v1194_v43 = vsel %vm470_vm1, %v1982_v37, 0  ;;  %v1124_v49 = vadd.f32 %v1891_v18, %v1730_v25 }
 0x2c1   : > { %v1115_v22 = vpop.f32.mrf.mxu0  ;;  %v1983_v39 = vld [vmem:[#allocation3] sm:$0xff]  }
 0x2c2   : > { %869 = vst.msk [vmem:[#allocation2 + $0x14] sm:$0xf] %vm863_vm3, %v1769_v19  ;;  %997 = vst.msk [vmem:[#allocation3 + $0x14] sm:$0xf] %vm863_vm3, %v1777_v21  ;;  %v1116_v27 = vadd.f32 %v1730_v25, %v1115_v22  ;;  %v1984_v44 = vld [vmem:[#allocation2] sm:$0xff]  }
 0x2c3   : > { %v1892_v24 = vpop.f32.mrf.mxu0  ;;  %v1191_v47 = vsel %vm470_vm1, %v1984_v44, 0 }
 0x2c4   : > { %v1127_v48 = vadd.f32 %v1892_v24, %v1730_v25 }
 0x2c5   : > { %v1118_v26 = vpop.f32.mrf.mxu0 }
 0x2c6   : > { %v1119_v28 = vadd.f32 %v1730_v25, %v1118_v26  ;;  %v1147_v51 = vpack.c.bf16 %v1127_v48, %v1124_v49 }
 0x2c7   : > { %v1977_v29 = vld [vmem:[#allocation2 + $0x18] sm:$0xff]   ;;  %v1895_v41 = vpop.f32.mrf.mxu0 }
 0x2c8   : > { %v1146_v30 = vpack.c.bf16 %v1119_v28, %v1116_v27  ;;  %v1978_v31 = vld [vmem:[#allocation3 + $0x18] sm:$0xff]   ;;  %1941 = vmatprep.subr.msk.bf16.mxu1 %vm470_vm1, %v1977_v29  ;;  %v1200_v32 = vsel %vm470_vm1, %v1977_v29, 0  ;;  %v1140_v54 = vadd.f32 %v1895_v41, %v1730_v25 }
 0x2c9   : > { %v1979_v33 = vld [vmem:[#allocation2 + $0x10] sm:$0xff]   ;;  %1913 = vmatprep.subr.bf16.mxu0 %v1978_v31  ;;  %1898 = vmatpush3.bf16.xpose.msra.mxu1 %v1200_v32  ;;  %v1131_v42 = vpop.f32.mrf.mxu0 }
 0x2ca   : > { %1905 = vmatprep.mubr.msk.bf16.mxu1 %vm470_vm1, %v1146_v30  ;;  %v1980_v34 = vld [vmem:[#allocation3 + $0x10] sm:$0xff]   ;;  %1914 = vmatpush3.bf16.msra.mxu0 %v1978_v31  ;;  %v1197_v36 = vsel %vm470_vm1, %v1979_v33, 0  ;;  %v1132_v50 = vadd.f32 %v1730_v25, %v1131_v42 }
 0x2cb   : > { %1942 = vmatprep.subr.msk.bf16.mxu1 %vm470_vm1, %v1979_v33  ;;  %1915 = vmatprep.subr.bf16.mxu0 %v1980_v34  ;;  %v1896_v45 = vpop.f32.mrf.mxu0 }
 0x2cc   : > { %v1143_v53 = vadd.f32 %v1896_v45, %v1730_v25 }
 0x2cd   : > { %v1134_v46 = vpop.f32.mrf.mxu0 }
 0x2ce   : > { %1916 = vmatpush3.bf16.msra.mxu0 %v1980_v34  ;;  %v1135_v40 = vadd.f32 %v1730_v25, %v1134_v46  ;;  %v1149_v55 = vpack.c.bf16 %v1143_v53, %v1140_v54 }
 0x2cf   : > { %1917 = vmatprep.subr.bf16.mxu0 %v1981_v35 }
 0x2d0   : > { %v1148_v52 = vpack.c.bf16 %v1135_v40, %v1132_v50 }
 0x2d1   : > { %1900 = vmatpush3.bf16.xpose.msra.mxu1 %v1197_v36 }
 0x2d2   : > { %1918 = vmatpush3.bf16.msra.mxu0 %v1981_v35  ;;  %1943 = vmatprep.subr.msk.bf16.mxu1 %vm470_vm1, %v1982_v37 }
 0x2d3   : > { %1919 = vmatprep.subr.bf16.mxu0 %v1983_v39 }
 0x2d6   : > { %1920 = vmatpush3.bf16.msra.mxu0 %v1983_v39 }
 0x2d9   : > { %1902 = vmatpush3.bf16.xpose.msra.mxu1 %v1194_v43 }
 0x2da   : > { %1944 = vmatprep.subr.msk.bf16.mxu1 %vm470_vm1, %v1984_v44 }
 0x2e1   : > { %1904 = vmatpush3.bf16.xpose.msra.mxu1 %v1191_v47 }
 0x2e8   : > { %1906 = vmatmul.mubr.msk.bf16.vlgmr.msra.gmra.mxu1 %vm470_vm1, %v1147_v51 }
 0x2e9   : > { %1909 = vmatprep.mubr.msk.bf16.mxu1 %vm470_vm1, %v1148_v52 }
 0x2f0   : > { %1910 = vmatmul.mubr.msk.bf16.gmra.mxu1 %vm470_vm1, %v1149_v55 }
 0x3a8   : > { %v1907_v56 = vpop.f32.mrf.mxu1 }
 0x3a9   : > { %v1274_v38 = vsel %vm1267_vm4, %v1907_v56, -inf }
 0x3aa   : > { %1275 = vmax.xlane.f32.xlu1 %v1274_v38  ;;  %v1236_v57 = vpop.f32.mrf.mxu1 }
 0x3ab   : > { %v1268_v58 = vsel %vm1267_vm4, %v1236_v57, -inf }
 0x3ac   : > { %1269 = vmax.xlane.f32.xlu0 %v1268_v58  ;;  %v1908_v59 = vpop.f32.mrf.mxu1 }
 0x3ad   : > { %v1277_v60 = vsel %vm1267_vm4, %v1908_v59, -inf }
 0x3ae   : > { %1278 = vmax.xlane.f32.xlu1 %v1277_v60  ;;  %v1239_v61 = vpop.f32.mrf.mxu1  ;;  %v1986_v60 = vld [vmem:[%s2367_s10] sm:$0xff]  }
 0x3af   : > { %v1271_v62 = vsel %vm1267_vm4, %v1239_v61, -inf }
 0x3b0   : > { %1272 = vmax.xlane.f32.xlu0 %v1271_v62  ;;  %v1911_v63 = vpop.f32.mrf.mxu1 }
 0x3b1   : > { %v1286_v4 = vsel %vm1267_vm4, %v1911_v63, -inf }
 0x3b2   : > { %v1252_v0 = vpop.f32.mrf.mxu1 }
 0x3b3   : > { %v1280_v1 = vsel %vm1267_vm4, %v1252_v0, -inf }
 0x3b4   : > { %1281 = vmax.xlane.f32.xlu0 %v1280_v1  ;;  %v1912_v2 = vpop.f32.mrf.mxu1 }
 0x3b5   : > { %v1289_v6 = vsel %vm1267_vm4, %v1912_v2, -inf }
 0x3b6   : > { %v1255_v3 = vpop.f32.mrf.mxu1 }
 0x3b7   : > { %v1283_v5 = vsel %vm1267_vm4, %v1255_v3, -inf }
 0x3b8   : > { %1287 = vmax.xlane.f32.xlu0 %v1286_v4  ;;  %1284 = vmax.xlane.f32.xlu1 %v1283_v5 }
 0x3bc   : > { %1290 = vmax.xlane.f32.xlu1 %v1289_v6 }
 0x433   : > { %v1276_v11 = vpop.xlane.xlu1 %1275 }
 0x434   : > { %v1294_v12 = vsub.f32 %v1907_v56, %v1276_v11 }
 0x435   : > { %v1270_v13 = vpop.xlane.xlu0 %1269 }
 0x436   : > { %v1292_v15 = vsub.f32 %v1236_v57, %v1270_v13  ;;  %v1304_v18 = vmul.f32 1.442695, %v1294_v12 }
 0x437   : > { %v1279_v16 = vpop.xlane.xlu1 %1278 }
 0x438   : > { %v1300_v19 = vmul.f32 1.442695, %v1292_v15  ;;  %v1295_v21 = vsub.f32 %v1908_v59, %v1279_v16  ;;  %v1985_v59 = vld [vmem:[%s2367_s10 + $0x8] sm:$0xff]  }
 0x439   : > { %v1273_v22 = vpop.xlane.xlu0 %1272  ;;  %1929 = vmatprep.subr.bf16.mxu0 %v1985_v59 }
 0x43a   : > { %1989 = vpow2.f32 %v1300_v19  ;;  %v1306_v24 = vmul.f32 1.442695, %v1295_v21  ;;  %v1293_v25 = vsub.f32 %v1239_v61, %v1273_v22 }
 0x43b   : > { %1991 = vpow2.f32 %v1304_v18 }
 0x43c   : > { %v1302_v26 = vmul.f32 1.442695, %v1293_v25  ;;  %1993 = vpow2.f32 %v1306_v24 }
 0x43d   : > { %v1282_v27 = vpop.xlane.xlu0 %1281 }
 0x43e   : > { %1995 = vpow2.f32 %v1302_v26  ;;  %v1296_v28 = vsub.f32 %v1252_v0, %v1282_v27 }
 0x440   : > { %v1308_v29 = vmul.f32 1.442695, %v1296_v28 }
 0x441   : > { %v1288_v30 = vpop.xlane.xlu0 %1287  ;;  %v1285_v31 = vpop.xlane.xlu1 %1284 }
 0x442   : > { %1997 = vpow2.f32 %v1308_v29  ;;  %v1298_v32 = vsub.f32 %v1911_v63, %v1288_v30  ;;  %v1297_v33 = vsub.f32 %v1255_v3, %v1285_v31 }
 0x444   : > { %v1312_v34 = vmul.f32 1.442695, %v1298_v32  ;;  %v1310_v35 = vmul.f32 1.442695, %v1297_v33 }
 0x445   : > { %v1291_v36 = vpop.xlane.xlu1 %1290 }
 0x446   : > { %1999 = vpow2.f32 %v1312_v34  ;;  %v1299_v37 = vsub.f32 %v1912_v2, %v1291_v36 }
 0x447   : > { %v1990_v39 = vpop.eup %1989  ;;  %2001 = vpow2.f32 %v1310_v35 }
 0x448   : > { %v1314_v41 = vmul.f32 1.442695, %v1299_v37  ;;  %v1316_v42 = vsel %vm1267_vm4, %v1990_v39, 0.0  ;;  %v1992_v43 = vpop.eup %1991 }
 0x449   : > { %1317 = vadd.xlane.f32.xlu0 %v1316_v42  ;;  %v1994_v44 = vpop.eup %1993  ;;  %v1322_v46 = vsel %vm1267_vm4, %v1992_v43, 0.0 }
 0x44a   : > { %2003 = vpow2.f32 %v1314_v41  ;;  %v1341_v40 = vpack.c.bf16 %v1994_v44, %v1992_v43  ;;  %v1325_v51 = vsel %vm1267_vm4, %v1994_v44, 0.0  ;;  %v1759_v44 = vld [vmem:[%s2368_s11] ss:$0 sm:$0xff] }
 0x44b   : > { %v1996_v45 = vpop.eup %1995 }
 0x44c   : > { %v1319_v47 = vsel %vm1267_vm4, %v1996_v45, 0.0  ;;  %v1340_v48 = vpack.c.bf16 %v1996_v45, %v1990_v39 }
 0x44d   : > { %1323 = vadd.xlane.f32.xlu0 %v1322_v46  ;;  %1320 = vadd.xlane.f32.xlu1 %v1319_v47 }
 0x44e   : > { %1921 = vmatprep.mubr.msk.bf16.mxu0 %vm1267_vm4, %v1340_v48 }
 0x44f   : > { %v1998_v49 = vpop.eup %1997  ;;  %1922 = vmatmul.mubr.msk.bf16.vlgmr.msra.gmra.mxu0 %vm1267_vm4, %v1341_v40 }
 0x450   : > { %v1328_v50 = vsel %vm1267_vm4, %v1998_v49, 0.0  ;;  %1930 = vmatpush3.bf16.msra.mxu0 %v1985_v59 }
 0x451   : > { %1329 = vadd.xlane.f32.xlu0 %v1328_v50  ;;  %1326 = vadd.xlane.f32.xlu1 %v1325_v51 }
 0x452   : > { %1931 = vmatprep.subr.bf16.mxu0 %v1986_v60 }
 0x453   : > { %v2000_v52 = vpop.eup %1999 }
 0x454   : > { %v2002_v53 = vpop.eup %2001  ;;  %v1334_v54 = vsel %vm1267_vm4, %v2000_v52, 0.0  ;;  %1932 = vmatpush3.bf16.msra.mxu0 %v1986_v60 }
 0x455   : > { %1335 = vadd.xlane.f32.xlu0 %v1334_v54  ;;  %v1331_v55 = vsel %vm1267_vm4, %v2002_v53, 0.0  ;;  %v1342_v56 = vpack.c.bf16 %v2002_v53, %v1998_v49 }
 0x456   : > { %1332 = vadd.xlane.f32.xlu1 %v1331_v55 }
 0x457   : > { %v2004_v38 = vpop.eup %2003  ;;  %1925 = vmatprep.mubr.msk.bf16.mxu0 %vm1267_vm4, %v1342_v56 }
 0x458   : > { %v1337_v57 = vsel %vm1267_vm4, %v2004_v38, 0.0  ;;  %v1343_v58 = vpack.c.bf16 %v2004_v38, %v2000_v52 }
 0x45a   : > { %1338 = vadd.xlane.f32.xlu1 %v1337_v57  ;;  %1926 = vmatmul.mubr.msk.bf16.gmra.mxu0 %vm1267_vm4, %v1343_v58 }
 0x4d2   : > { %v1318_v62 = vpop.xlane.xlu0 %1317 }
 0x4d3   : > { %2005 = vrcp.f32 %v1318_v62 }
 0x4d6   : > { %v1321_v61 = vpop.xlane.xlu1 %1320  ;;  %v1324_v0 = vpop.xlane.xlu0 %1323 }
 0x4da   : > { %v1327_v63 = vpop.xlane.xlu1 %1326  ;;  %v1330_v2 = vpop.xlane.xlu0 %1329 }
 0x4db   : > { %2007 = vrcp.f32 %v1327_v63 }
 0x4dc   : > { %2009 = vrcp.f32 %v1321_v61 }
 0x4dd   : > { %2011 = vrcp.f32 %v1324_v0 }
 0x4de   : > { %2013 = vrcp.f32 %v1330_v2  ;;  %v1336_v5 = vpop.xlane.xlu0 %1335 }
 0x4df   : > { %v1333_v1 = vpop.xlane.xlu1 %1332 }
 0x4e0   : > { %v2006_v11 = vpop.eup %2005 }
 0x4e3   : > { %v1339_v3 = vpop.xlane.xlu1 %1338 }
 0x4e4   : > { %2015 = vrcp.f32 %v1339_v3 }
 0x4e5   : > { %2017 = vrcp.f32 %v1333_v1 }
 0x4e6   : > { %2019 = vrcp.f32 %v1336_v5 }
 0x4e8   : > { %v2008_v13 = vpop.eup %2007 }
 0x4e9   : > { %v2010_v15 = vpop.eup %2009 }
 0x4ea   : > { %v2012_v19 = vpop.eup %2011 }
 0x4eb   : > { %v2014_v29 = vpop.eup %2013 }
 0x4f1   : > { %v2016_v31 = vpop.eup %2015 }
 0x4f2   : > { %v2018_v32 = vpop.eup %2017 }
 0x4f3   : > { %v2020_v35 = vpop.eup %2019 }
 0x50f   : > { %v1923_v4 = vpop.f32.mrf.mxu0 }
 0x510   : > { %v1463_v24 = vmul.f32 %v2012_v19, %v1923_v4 }
 0x511   : > { %v1422_v6 = vpop.f32.mrf.mxu0 }
 0x512   : > { %v1461_v21 = vmul.f32 %v2006_v11, %v1422_v6 }
 0x513   : > { %v1924_v12 = vpop.f32.mrf.mxu0 }
 0x514   : > { %v1464_v16 = vmul.f32 %v2008_v13, %v1924_v12 }
 0x515   : > { %v1425_v18 = vpop.f32.mrf.mxu0 }
 0x516   : > { %v1462_v22 = vmul.f32 %v2010_v15, %v1425_v18  ;;  %v1470_v26 = vpack.c.bf16 %v1464_v16, %v1463_v24 }
 0x518   : > { %v1469_v25 = vpack.c.bf16 %v1462_v22, %v1461_v21 }
 0x51a   : > { %v1927_v27 = vpop.f32.mrf.mxu0  ;;  %1933 = vmatprep.mubr.msk.bf16.mxu0 %vm470_vm1, %v1469_v25 }
 0x51b   : > { %1934 = vmatmul.mubr.msk.bf16.vlgmr.msra.gmra.mxu0 %vm470_vm1, %v1470_v26  ;;  %v1467_v39 = vmul.f32 %v2020_v35, %v1927_v27 }
 0x51c   : > { %v1438_v28 = vpop.f32.mrf.mxu0 }
 0x51d   : > { %v1465_v36 = vmul.f32 %v2014_v29, %v1438_v28 }
 0x51e   : > { %v1928_v30 = vpop.f32.mrf.mxu0 }
 0x51f   : > { %v1468_v33 = vmul.f32 %v2016_v31, %v1928_v30 }
 0x520   : > { %v1441_v34 = vpop.f32.mrf.mxu0 }
 0x521   : > { %v1466_v37 = vmul.f32 %v2018_v32, %v1441_v34  ;;  %v1472_v42 = vpack.c.bf16 %v1468_v33, %v1467_v39 }
 0x523   : > { %v1471_v41 = vpack.c.bf16 %v1466_v37, %v1465_v36 }
 0x525   : > { %1937 = vmatprep.mubr.msk.bf16.mxu0 %vm470_vm1, %v1471_v41 }
 0x526   : > { %1938 = vmatmul.mubr.msk.bf16.gmra.mxu0 %vm470_vm1, %v1472_v42 }
 0x5db   : > { %v1935_v43 = vpop.f32.mrf.mxu0 }
 0x5dc   : > { %v1568_v45 = vadd.f32 %v1935_v43, %v2149_v9 }
 0x5dd   : > { %v1535_v46 = vpop.f32.mrf.mxu0 }
 0x5de   : > { %v1583_v47 = vadd.f32 %v1759_v44, %v1568_v45  ;;  %v1566_v48 = vadd.f32 %v1535_v46, %v2145_v7 }
 0x5df   : > { %v1936_v40 = vpop.f32.mrf.mxu0 }
 0x5e0   : > { %1591 = vst.msk [vmem:[%s446_s19 + $0x10] sm:$0xff] %vm470_vm1, %v1583_v47  ;;  %v1581_v49 = vadd.f32 %v1759_v44, %v1566_v48  ;;  %v1569_v50 = vadd.f32 %v1936_v40, %v2151_v10 }
 0x5e1   : > { %v1538_v51 = vpop.f32.mrf.mxu0 }
 0x5e2   : > { %1589 = vst.msk [vmem:[%s446_s19] sm:$0xff] %vm470_vm1, %v1581_v49  ;;  %v1584_v52 = vadd.f32 %v1759_v44, %v1569_v50  ;;  %v1567_v9 = vadd.f32 %v1538_v51, %v2147_v8 }
 0x5e4   : > { %1592 = vst.msk [vmem:[%s446_s19 + $0x18] sm:$0xff] %vm470_vm1, %v1584_v52  ;;  %v1582_v53 = vadd.f32 %v1759_v44, %v1567_v9 }
 0x5e6   : > { %1590 = vst.msk [vmem:[%s446_s19 + $0x8] sm:$0xff] %vm470_vm1, %v1582_v53  ;;  %v1939_v54 = vpop.f32.mrf.mxu0 }
 0x5e7   : > { %v1572_v7 = vadd.f32 %v1939_v54, %v2167_v20 }
 0x5e8   : > { %v1551_v55 = vpop.f32.mrf.mxu0 }
 0x5e9   : > { %v1587_v56 = vadd.f32 %v1759_v44, %v1572_v7  ;;  %v1570_v38 = vadd.f32 %v1551_v55, %v2159_v14 }
 0x5ea   : > { %v1940_v57 = vpop.f32.mrf.mxu0 }
 0x5eb   : > { %1595 = vst.msk [vmem:[%s446_s19 + $0x30] sm:$0xff] %vm470_vm1, %v1587_v56  ;;  %v1585_v10 = vadd.f32 %v1759_v44, %v1570_v38  ;;  %v1573_v58 = vadd.f32 %v1940_v57, %v2171_v23 }
 0x5ec   : > { %v1554_v59 = vpop.f32.mrf.mxu0 }
 0x5ed   : > { %1593 = vst.msk [vmem:[%s446_s19 + $0x20] sm:$0xff] %vm470_vm1, %v1585_v10  ;;  %v1588_v8 = vadd.f32 %v1759_v44, %v1573_v58  ;;  %v1571_v60 = vadd.f32 %v1554_v59, %v2163_v17 }
 0x5ef   : > { %1596 = vst.msk [vmem:[%s446_s19 + $0x38] sm:$0xff] %vm470_vm1, %v1588_v8  ;;  %v1586_v61 = vadd.f32 %v1759_v44, %v1571_v60 }
 0x5f1   : > { %1594 = vst.msk [vmem:[%s446_s19 + $0x28] sm:$0xff] %vm470_vm1, %v1586_v61 }
 0x5f2 PF: > { %s22_s23 = sadd.s32 1, %s2043_s23   ;;  %s2370_s21 = smov %s2039_s22 }
 0x5f3   : > { %p19_p5 = scmp.ge.s32.totalorder %s22_s23, 4   ;;  %s2371_s22 = smov %s2373_s24 }
 0x5f5   :  { %21 = sbr.rel (!%p19_p5) target bundleno = 2 (0x2), region = 103 }

</bundles_post_ra>
